<compile_context>
chip_gen: v5e
topology: v5e:2x2
jax: 0.10.0
libtpu: 0.0.40
codegen_flags: <defaults>
</compile_context>

<pallas_src>
import math
import numpy as np

import jax
import jax.numpy as jnp
from jax.experimental import pallas as pl
from jax.experimental.pallas import tpu as pltpu

# ----------------------------- configuration -------------------------------
B = 2                      # batch
NUM_NODES = 16             # graph nodes
OUTPUT_DIM = 2             # per-node decoder output dim
RNN_UNITS = 32             # GRU hidden units per node
MAX_DIFFUSION_STEP = 2     # Chebyshev diffusion order K
NUM_RNN_LAYERS = 2
NUM_SUPPORTS = 2           # "dual_random_walk" -> 2 support matrices
NUM_MATRICES = NUM_SUPPORTS * MAX_DIFFUSION_STEP + 1

BN = B * NUM_NODES         # rows of every in-kernel activation tile
U = RNN_UNITS
SLAB_W = OUTPUT_DIM + NUM_RNN_LAYERS * U          # 66: [proj | h0 | h1]
MF_MAX = NUM_MATRICES * (U + U)                   # 320: widest joint-chain contraction

_PREC_REF = jax.lax.Precision.HIGHEST             # reference only


# ----------------------------- fused decoder kernel -------------------------
def decoder_step_kernel(xh_ref, sup_ref, wj_ref, wrh_ref, misc_ref, out_ref):
    """Whole decoder step (L stacked DCGRU cells + projection) in one call.

    xh_ref  : (BN, OUTPUT_DIM + L*U) f32   [x | h0 | h1]
    sup_ref : (S, BN, BN)            bf16  block-diagonal supports
    wj_ref  : (L, MF_MAX, 3U)        bf16  joint [x|hx]-chain weights (Cheb-folded,
                                           layer 0 zero-padded along rows)
    wrh_ref : (L+1, M*U, U)          bf16  r*hx-chain weights; slice [L][:U, :D] = proj_w
    misc_ref: (L+1, 1, 3U)           f32   rows 0..L-1 = gate biases; row L[:, :D] = proj_b
    out_ref : (BN, OUTPUT_DIM + L*U) f32   [proj | h0' | h1']
    """
    sup = sup_ref[...].astype(jnp.float32)        # tiny upcast once; DMA stays bf16
    xh = xh_ref[...]

    def diffuse_cat(z):
        # Plain-power pieces [z, A0 z, A0^2 z, A1 z, A1^2 z] lane-concatenated, bf16.
        pieces = [z]
        for s in range(NUM_SUPPORTS):
            p = z
            for _ in range(MAX_DIFFUSION_STEP):
                p = jnp.dot(sup[s], p, preferred_element_type=jnp.float32)
                pieces.append(p)
        return jnp.concatenate(pieces, axis=-1).astype(jnp.bfloat16)

    x = xh[:, :OUTPUT_DIM]
    new_h = []
    for l in range(NUM_RNN_LAYERS):
        hx = xh[:, OUTPUT_DIM + l * U: OUTPUT_DIM + (l + 1) * U]
        mf = NUM_MATRICES * (x.shape[1] + U)

        # Joint chain over [x | hx]: one wide matmul gives r, u and the c input-path.
        zp = diffuse_cat(jnp.concatenate([x, hx], axis=-1))      # (BN, mf) bf16
        wj = wj_ref[l]
        if mf < MF_MAX:
            wj = wj[:mf]
        joint = jnp.dot(zp, wj, preferred_element_type=jnp.float32)   # (BN, 3U)

        bias = misc_ref[l]                                        # (1, 3U)
        gates = jax.nn.sigmoid(joint[:, :2 * U] + bias[:, :2 * U])
        r = gates[:, :U]
        u = gates[:, U:]

        # Candidate: input-path already in `joint`; state-path from the r*hx chain.
        rhp = diffuse_cat(r * hx)                                 # (BN, M*U) bf16
        c_state = jnp.dot(rhp, wrh_ref[l], preferred_element_type=jnp.float32)
        c = jnp.tanh(joint[:, 2 * U:] + c_state + bias[:, 2 * U:])

        x = u * hx + (1.0 - u) * c
        new_h.append(x)

    proj_w = wrh_ref[NUM_RNN_LAYERS][:U]                          # (U, U), cols [:D] valid
    proj = jnp.dot(x.astype(jnp.bfloat16), proj_w,
                   preferred_element_type=jnp.float32)[:, :OUTPUT_DIM]
    proj = proj + misc_ref[NUM_RNN_LAYERS][:, :OUTPUT_DIM]

    out_ref[...] = jnp.concatenate([proj] + new_h, axis=-1)       # single packed store


def _decoder_forward_impl(inputs, hidden_state, sup_blk, wj_pack, wrh_pack, misc):
    """inputs: (B, N*OUTPUT_DIM); hidden_state: (L, B, N*U)."""
    inp2d = inputs.reshape(BN, OUTPUT_DIM)
    hid = hidden_state.reshape(NUM_RNN_LAYERS, BN, U)
    xh = jnp.concatenate([inp2d] + [hid[l] for l in range(NUM_RNN_LAYERS)], axis=-1)

    vm = pl.BlockSpec(memory_space=pltpu.MemorySpace.VMEM)
    slab = pl.pallas_call(
        decoder_step_kernel,
        out_shape=jax.ShapeDtypeStruct((BN, SLAB_W), jnp.float32),
        in_specs=[vm, vm, vm, vm, vm],
        out_specs=vm,
    )(xh, sup_blk, wj_pack, wrh_pack, misc)

    out = slab[:, :OUTPUT_DIM].reshape(B, NUM_NODES * OUTPUT_DIM)
    hout = jnp.stack([
        slab[:, OUTPUT_DIM + l * U: OUTPUT_DIM + (l + 1) * U].reshape(B, NUM_NODES * U)
        for l in range(NUM_RNN_LAYERS)])
    return out, hout


decoder_forward = jax.jit(_decoder_forward_impl)


# ----------------------------- parameter init / packing ---------------------
def _xavier_normal(key, shape):
    fan_in, fan_out = shape
    std = math.sqrt(2.0 / (fan_in + fan_out))
    return std * jax.random.normal(key, shape, dtype=jnp.float32)


def _cheb_to_power(w):
    """Fold Chebyshev recurrence constants into per-piece weights (exact).

    w: (M, F, O) weights for pieces [x, T1(A0)x..TK(A0)x, T1(A1)x..TK(A1)x]
    -> weights for plain powers      [x, A0 x..A0^K x,     A1 x..A1^K x].
    """
    K, S = MAX_DIFFUSION_STEP, NUM_SUPPORTS
    C = np.zeros((K + 1, K + 1), np.float64)          # C[k, j]: coeff of A^j in T_k(A)
    C[0, 0] = 1.0
    if K >= 1:
        C[1, 1] = 1.0
    for k in range(2, K + 1):
        C[k, 1:] += 2.0 * C[k - 1, :-1]
        C[k, :] -= C[k - 2, :]
    w = np.asarray(w, np.float64)
    out = np.zeros_like(w)
    out[0] = w[0]
    for s in range(S):
        base = 1 + s * K
        for k in range(1, K + 1):
            out[0] += C[k, 0] * w[base + k - 1]
            for j in range(1, k + 1):
                out[base + j - 1] += C[k, j] * w[base + k - 1]
    return out.astype(np.float32)


def init_params(key):
    """Returns (packed kernel params, per-layer reference params, proj_w, proj_b)."""
    keys = jax.random.split(key, NUM_RNN_LAYERS * 2 + 2)
    m = NUM_MATRICES
    ref_params = []
    wj_pack = np.zeros((NUM_RNN_LAYERS, MF_MAX, 3 * U), np.float32)
    wrh_pack = np.zeros((NUM_RNN_LAYERS + 1, m * U, U), np.float32)

    for l in range(NUM_RNN_LAYERS):
        din = OUTPUT_DIM if l == 0 else U
        f = din + U
        # torch layout: (input_size * num_matrices, out) with row index fdim*M + mm
        w_ru_full = _xavier_normal(keys[2 * l], (f * m, 2 * U))
        w_c_full = _xavier_normal(keys[2 * l + 1], (f * m, U))
        ref_params.append(dict(w_ru_full=w_ru_full, w_c_full=w_c_full,
                               b_ru_full=jnp.full((2 * U,), 1.0, jnp.float32),
                               b_c_full=jnp.zeros((U,), jnp.float32)))

        # (M, F, O) layout matching piece-major concatenation: w[mm, fdim] = full[fdim*M+mm]
        w_ru = np.transpose(np.asarray(w_ru_full).reshape(f, m, 2 * U), (1, 0, 2))
        w_c = np.transpose(np.asarray(w_c_full).reshape(f, m, U), (1, 0, 2))

        # Joint [x|hx]-chain weight: x rows get [r|u|c]; hx rows get [r|u|0]
        # (c's state contribution comes from the separate diff(r*hx) chain).
        w_joint = np.zeros((m, f, 3 * U), np.float32)
        w_joint[:, :, :2 * U] = w_ru
        w_joint[:, :din, 2 * U:] = w_c[:, :din, :]
        w_st_c = w_c[:, din:, :]                                  # (M, U, U)

        w_joint = _cheb_to_power(w_joint)
        w_st_c = _cheb_to_power(w_st_c)

        wj_pack[l, :m * f, :] = w_joint.reshape(m * f, 3 * U)     # layer 0 zero-padded
        wrh_pack[l] = w_st_c.reshape(m * U, U)

    bound = 1.0 / math.sqrt(U)
    proj_w = jax.random.uniform(keys[-2], (U, OUTPUT_DIM), jnp.float32, -bound, bound)
    proj_b = jax.random.uniform(keys[-1], (1, OUTPUT_DIM), jnp.float32, -bound, bound)
    wrh_pack[NUM_RNN_LAYERS, :U, :OUTPUT_DIM] = np.asarray(proj_w)

    misc = np.zeros((NUM_RNN_LAYERS + 1, 1, 3 * U), np.float32)
    misc[:NUM_RNN_LAYERS, 0, :2 * U] = 1.0            # bias_start 1.0 for r/u, 0.0 for c
    misc[NUM_RNN_LAYERS, 0, :OUTPUT_DIM] = np.asarray(proj_b)[0]

    packed = (jnp.asarray(wj_pack, jnp.bfloat16),
              jnp.asarray(wrh_pack, jnp.bfloat16),
              jnp.asarray(misc, jnp.float32))
    return packed, ref_params, proj_w, proj_b


# ----------------------------- pure-JAX reference (mirrors PyTorch) --------
def _gconv_ref(inp, state, supports, w_full, bias):
    bb, n, _ = inp.shape
    x = jnp.concatenate([inp, state], axis=2)
    f = x.shape[2]
    x0 = jnp.transpose(x, (1, 2, 0)).reshape(n, f * bb)
    xs = [x0]
    for s in range(NUM_SUPPORTS):
        a = supports[s]
        x1 = jnp.matmul(a, x0, precision=_PREC_REF)
        xs.append(x1)
        xp, xc = x0, x1
        for _ in range(2, MAX_DIFFUSION_STEP + 1):
            x2 = 2.0 * jnp.matmul(a, xc, precision=_PREC_REF) - xp
            xs.append(x2)
            xp, xc = xc, x2
    xst = jnp.stack(xs, 0).reshape(NUM_MATRICES, n, f, bb)
    xst = jnp.transpose(xst, (3, 1, 2, 0)).reshape(bb * n, f * NUM_MATRICES)
    val = jnp.matmul(xst, w_full, precision=_PREC_REF) + bias
    return val.reshape(bb, n, -1)


def _dcgru_cell_ref(inp_flat, hx_flat, supports, p):
    inp = inp_flat.reshape(B, NUM_NODES, -1)
    hx = hx_flat.reshape(B, NUM_NODES, U)
    value = jax.nn.sigmoid(_gconv_ref(inp, hx, supports, p["w_ru_full"], p["b_ru_full"]))
    r = value[..., :U].reshape(B, -1)
    u = value[..., U:].reshape(B, -1)
    rh = (r * hx_flat).reshape(B, NUM_NODES, U)
    c = jnp.tanh(_gconv_ref(inp, rh, supports, p["w_c_full"], p["b_c_full"])).reshape(B, -1)
    return u * hx_flat + (1.0 - u) * c


def decoder_reference(inputs, hidden_state, supports, ref_params, proj_w, proj_b):
    output = inputs
    hs = []
    for l in range(NUM_RNN_LAYERS):
        output = _dcgru_cell_ref(output, hidden_state[l], supports, ref_params[l])
        hs.append(output)
    projected = jnp.matmul(output.reshape(-1, U), proj_w, precision=_PREC_REF) + proj_b[0]
    return projected.reshape(B, NUM_NODES * OUTPUT_DIM), jnp.stack(hs)


# ----------------------------- main -----------------------------------------
if __name__ == "__main__":
    key = jax.random.PRNGKey(0)
    k_adj, k_in, k_h, k_par = jax.random.split(key, 4)

    # Dense "dual random walk" supports: D^-1 A and D^-1 A^T (synthetic graph).
    adj = jax.random.uniform(k_adj, (NUM_NODES, NUM_NODES), jnp.float32)
    p_fwd = adj / jnp.sum(adj, axis=1, keepdims=True)
    p_bwd = adj.T / jnp.sum(adj.T, axis=1, keepdims=True)
    supports = jnp.stack([p_fwd, p_bwd])                                # (S, N, N)

    # Block-diagonal supports so one dense matmul diffuses the whole batch (fine at 32x32).
    eye_b = jnp.eye(B, dtype=jnp.float32)
    sup_blk = jnp.stack([jnp.kron(eye_b, supports[s])
                         for s in range(NUM_SUPPORTS)]).astype(jnp.bfloat16)

    (wj_pack, wrh_pack, misc), ref_params, proj_w, proj_b = init_params(k_par)

    inputs = jax.random.normal(k_in, (B, NUM_NODES * OUTPUT_DIM), jnp.float32)
    hidden = 0.1 * jax.random.normal(
        k_h, (NUM_RNN_LAYERS, B, NUM_NODES * U), jnp.float32)

    out, new_hidden = decoder_forward(inputs, hidden, sup_blk, wj_pack, wrh_pack, misc)
    jax.block_until_ready((out, new_hidden))

    ref_out, ref_hidden = decoder_reference(inputs, hidden, supports,
                                            ref_params, proj_w, proj_b)

    assert out.shape == (B, NUM_NODES * OUTPUT_DIM)
    assert new_hidden.shape == (NUM_RNN_LAYERS, B, NUM_NODES * U)
    # Kernel uses bf16 MXU operands with f32 accumulation; reference is f32 HIGHEST,
    # hence the 1e-2 tolerance.
    assert np.allclose(np.asarray(out), np.asarray(ref_out), atol=1e-2, rtol=1e-2)
    assert np.allclose(np.asarray(new_hidden), np.asarray(ref_hidden),
                       atol=1e-2, rtol=1e-2)
    print("KERNEL_OK")
</pallas_src>

<mosaic_0001>
module attributes {stable_mosaic.version = 11 : i64} {
  func.func @decoder_step_kernel(%arg0: memref<32x66xf32, #tpu.memory_space<vmem>>, %arg1: memref<2x32x32xbf16, #tpu.memory_space<vmem>>, %arg2: memref<2x320x96xbf16, #tpu.memory_space<vmem>>, %arg3: memref<3x160x32xbf16, #tpu.memory_space<vmem>>, %arg4: memref<3x1x96xf32, #tpu.memory_space<vmem>>, %arg5: memref<32x66xf32, #tpu.memory_space<vmem>>) attributes {dimension_semantics = [], scalar_prefetch = 0 : i64, scratch_operands = 0 : i64, tpu.core_type = #tpu.core_type<tc>} {
    %c0 = arith.constant 0 : index
    %c0_0 = arith.constant 0 : index
    %c0_1 = arith.constant 0 : index
    %0 = vector.load %arg1[%c0, %c0_0, %c0_1] : memref<2x32x32xbf16, #tpu.memory_space<vmem>>, vector<2x32x32xbf16>
    %1 = arith.extf %0 : vector<2x32x32xbf16> to vector<2x32x32xf32>
    %c0_2 = arith.constant 0 : index
    %c0_3 = arith.constant 0 : index
    %2 = vector.load %arg0[%c0_2, %c0_3] : memref<32x66xf32, #tpu.memory_space<vmem>>, vector<32x66xf32>
    %3 = vector.extract_strided_slice %2 {offsets = [0, 0], sizes = [32, 2], strides = [1, 1]} : vector<32x66xf32> to vector<32x2xf32>
    %4 = vector.extract_strided_slice %2 {offsets = [0, 2], sizes = [32, 32], strides = [1, 1]} : vector<32x66xf32> to vector<32x32xf32>
    %5 = tpu.concatenate %3, %4 in 1 : vector<32x2xf32>, vector<32x32xf32> -> vector<32x34xf32>
    %6 = vector.extract_strided_slice %1 {offsets = [0, 0, 0], sizes = [1, 32, 32], strides = [1, 1, 1]} : vector<2x32x32xf32> to vector<1x32x32xf32>
    %7 = vector.shape_cast %6 : vector<1x32x32xf32> to vector<32x32xf32>
    %cst = arith.constant dense<0.000000e+00> : vector<32x34xf32>
    %8 = tpu.matmul %7, %5, %cst {dimension_numbers = #tpu.dot_dimension_numbers<[1], [0], [0], [1], [0, 0, 1, 1], [], []>} : vector<32x32xf32>, vector<32x34xf32>, vector<32x34xf32> -> vector<32x34xf32>
    %9 = vector.extract_strided_slice %1 {offsets = [0, 0, 0], sizes = [1, 32, 32], strides = [1, 1, 1]} : vector<2x32x32xf32> to vector<1x32x32xf32>
    %10 = vector.shape_cast %9 : vector<1x32x32xf32> to vector<32x32xf32>
    %cst_4 = arith.constant dense<0.000000e+00> : vector<32x34xf32>
    %11 = tpu.matmul %10, %8, %cst_4 {dimension_numbers = #tpu.dot_dimension_numbers<[1], [0], [0], [1], [0, 0, 1, 1], [], []>} : vector<32x32xf32>, vector<32x34xf32>, vector<32x34xf32> -> vector<32x34xf32>
    %12 = vector.extract_strided_slice %1 {offsets = [1, 0, 0], sizes = [1, 32, 32], strides = [1, 1, 1]} : vector<2x32x32xf32> to vector<1x32x32xf32>
    %13 = vector.shape_cast %12 : vector<1x32x32xf32> to vector<32x32xf32>
    %cst_5 = arith.constant dense<0.000000e+00> : vector<32x34xf32>
    %14 = tpu.matmul %13, %5, %cst_5 {dimension_numbers = #tpu.dot_dimension_numbers<[1], [0], [0], [1], [0, 0, 1, 1], [], []>} : vector<32x32xf32>, vector<32x34xf32>, vector<32x34xf32> -> vector<32x34xf32>
    %15 = vector.extract_strided_slice %1 {offsets = [1, 0, 0], sizes = [1, 32, 32], strides = [1, 1, 1]} : vector<2x32x32xf32> to vector<1x32x32xf32>
    %16 = vector.shape_cast %15 : vector<1x32x32xf32> to vector<32x32xf32>
    %cst_6 = arith.constant dense<0.000000e+00> : vector<32x34xf32>
    %17 = tpu.matmul %16, %14, %cst_6 {dimension_numbers = #tpu.dot_dimension_numbers<[1], [0], [0], [1], [0, 0, 1, 1], [], []>} : vector<32x32xf32>, vector<32x34xf32>, vector<32x34xf32> -> vector<32x34xf32>
    %18 = tpu.concatenate %5, %8, %11, %14, %17 in 1 : vector<32x34xf32>, vector<32x34xf32>, vector<32x34xf32>, vector<32x34xf32>, vector<32x34xf32> -> vector<32x170xf32>
    %19 = arith.truncf %18 : vector<32x170xf32> to vector<32x170xbf16>
    %c0_7 = arith.constant 0 : index
    %c0_8 = arith.constant 0 : index
    %c0_9 = arith.constant 0 : index
    %20 = vector.load %arg2[%c0_7, %c0_8, %c0_9] : memref<2x320x96xbf16, #tpu.memory_space<vmem>>, vector<1x320x96xbf16>
    %21 = vector.shape_cast %20 : vector<1x320x96xbf16> to vector<320x96xbf16>
    %22 = vector.extract_strided_slice %21 {offsets = [0, 0], sizes = [170, 96], strides = [1, 1]} : vector<320x96xbf16> to vector<170x96xbf16>
    %cst_10 = arith.constant dense<0.000000e+00> : vector<32x96xf32>
    %23 = tpu.matmul %19, %22, %cst_10 {dimension_numbers = #tpu.dot_dimension_numbers<[1], [0], [0], [1], [0, 0, 1, 1], [], []>} : vector<32x170xbf16>, vector<170x96xbf16>, vector<32x96xf32> -> vector<32x96xf32>
    %c0_11 = arith.constant 0 : index
    %c0_12 = arith.constant 0 : index
    %c0_13 = arith.constant 0 : index
    %24 = vector.load %arg4[%c0_11, %c0_12, %c0_13] : memref<3x1x96xf32, #tpu.memory_space<vmem>>, vector<1x1x96xf32>
    %25 = vector.shape_cast %24 : vector<1x1x96xf32> to vector<1x96xf32>
    %26 = vector.extract_strided_slice %23 {offsets = [0, 0], sizes = [32, 64], strides = [1, 1]} : vector<32x96xf32> to vector<32x64xf32>
    %27 = vector.extract_strided_slice %25 {offsets = [0, 0], sizes = [1, 64], strides = [1, 1]} : vector<1x96xf32> to vector<1x64xf32>
    %28 = vector.broadcast %27 : vector<1x64xf32> to vector<32x64xf32>
    %29 = arith.addf %26, %28 : vector<32x64xf32>
    %30 = arith.negf %29 : vector<32x64xf32>
    %31 = math.exp %30 : vector<32x64xf32>
    %cst_14 = arith.constant 1.000000e+00 : f32
    %32 = vector.broadcast %cst_14 : f32 to vector<32x64xf32>
    %33 = arith.addf %32, %31 : vector<32x64xf32>
    %34 = arith.divf %32, %33 : vector<32x64xf32>
    %35 = vector.extract_strided_slice %34 {offsets = [0, 0], sizes = [32, 32], strides = [1, 1]} : vector<32x64xf32> to vector<32x32xf32>
    %36 = vector.extract_strided_slice %34 {offsets = [0, 32], sizes = [32, 32], strides = [1, 1]} : vector<32x64xf32> to vector<32x32xf32>
    %37 = arith.mulf %35, %4 : vector<32x32xf32>
    %38 = vector.extract_strided_slice %1 {offsets = [0, 0, 0], sizes = [1, 32, 32], strides = [1, 1, 1]} : vector<2x32x32xf32> to vector<1x32x32xf32>
    %39 = vector.shape_cast %38 : vector<1x32x32xf32> to vector<32x32xf32>
    %cst_15 = arith.constant dense<0.000000e+00> : vector<32x32xf32>
    %40 = tpu.matmul %39, %37, %cst_15 {dimension_numbers = #tpu.dot_dimension_numbers<[1], [0], [0], [1], [0, 0, 1, 1], [], []>} : vector<32x32xf32>, vector<32x32xf32>, vector<32x32xf32> -> vector<32x32xf32>
    %41 = vector.extract_strided_slice %1 {offsets = [0, 0, 0], sizes = [1, 32, 32], strides = [1, 1, 1]} : vector<2x32x32xf32> to vector<1x32x32xf32>
    %42 = vector.shape_cast %41 : vector<1x32x32xf32> to vector<32x32xf32>
    %cst_16 = arith.constant dense<0.000000e+00> : vector<32x32xf32>
    %43 = tpu.matmul %42, %40, %cst_16 {dimension_numbers = #tpu.dot_dimension_numbers<[1], [0], [0], [1], [0, 0, 1, 1], [], []>} : vector<32x32xf32>, vector<32x32xf32>, vector<32x32xf32> -> vector<32x32xf32>
    %44 = vector.extract_strided_slice %1 {offsets = [1, 0, 0], sizes = [1, 32, 32], strides = [1, 1, 1]} : vector<2x32x32xf32> to vector<1x32x32xf32>
    %45 = vector.shape_cast %44 : vector<1x32x32xf32> to vector<32x32xf32>
    %cst_17 = arith.constant dense<0.000000e+00> : vector<32x32xf32>
    %46 = tpu.matmul %45, %37, %cst_17 {dimension_numbers = #tpu.dot_dimension_numbers<[1], [0], [0], [1], [0, 0, 1, 1], [], []>} : vector<32x32xf32>, vector<32x32xf32>, vector<32x32xf32> -> vector<32x32xf32>
    %47 = vector.extract_strided_slice %1 {offsets = [1, 0, 0], sizes = [1, 32, 32], strides = [1, 1, 1]} : vector<2x32x32xf32> to vector<1x32x32xf32>
    %48 = vector.shape_cast %47 : vector<1x32x32xf32> to vector<32x32xf32>
    %cst_18 = arith.constant dense<0.000000e+00> : vector<32x32xf32>
    %49 = tpu.matmul %48, %46, %cst_18 {dimension_numbers = #tpu.dot_dimension_numbers<[1], [0], [0], [1], [0, 0, 1, 1], [], []>} : vector<32x32xf32>, vector<32x32xf32>, vector<32x32xf32> -> vector<32x32xf32>
    %50 = tpu.concatenate %37, %40, %43, %46, %49 in 1 : vector<32x32xf32>, vector<32x32xf32>, vector<32x32xf32>, vector<32x32xf32>, vector<32x32xf32> -> vector<32x160xf32>
    %51 = arith.truncf %50 : vector<32x160xf32> to vector<32x160xbf16>
    %c0_19 = arith.constant 0 : index
    %c0_20 = arith.constant 0 : index
    %c0_21 = arith.constant 0 : index
    %52 = vector.load %arg3[%c0_19, %c0_20, %c0_21] : memref<3x160x32xbf16, #tpu.memory_space<vmem>>, vector<1x160x32xbf16>
    %53 = vector.shape_cast %52 : vector<1x160x32xbf16> to vector<160x32xbf16>
    %cst_22 = arith.constant dense<0.000000e+00> : vector<32x32xf32>
    %54 = tpu.matmul %51, %53, %cst_22 {dimension_numbers = #tpu.dot_dimension_numbers<[1], [0], [0], [1], [0, 0, 1, 1], [], []>} : vector<32x160xbf16>, vector<160x32xbf16>, vector<32x32xf32> -> vector<32x32xf32>
    %55 = vector.extract_strided_slice %23 {offsets = [0, 64], sizes = [32, 32], strides = [1, 1]} : vector<32x96xf32> to vector<32x32xf32>
    %56 = arith.addf %55, %54 : vector<32x32xf32>
    %57 = vector.extract_strided_slice %25 {offsets = [0, 64], sizes = [1, 32], strides = [1, 1]} : vector<1x96xf32> to vector<1x32xf32>
    %58 = vector.broadcast %57 : vector<1x32xf32> to vector<32x32xf32>
    %59 = arith.addf %56, %58 : vector<32x32xf32>
    %60 = math.tanh %59 : vector<32x32xf32>
    %61 = arith.mulf %36, %4 : vector<32x32xf32>
    %cst_23 = arith.constant 1.000000e+00 : f32
    %62 = vector.broadcast %cst_23 : f32 to vector<32x32xf32>
    %63 = arith.subf %62, %36 : vector<32x32xf32>
    %64 = arith.mulf %63, %60 : vector<32x32xf32>
    %65 = arith.addf %61, %64 : vector<32x32xf32>
    %66 = vector.extract_strided_slice %2 {offsets = [0, 34], sizes = [32, 32], strides = [1, 1]} : vector<32x66xf32> to vector<32x32xf32>
    %67 = tpu.concatenate %65, %66 in 1 : vector<32x32xf32>, vector<32x32xf32> -> vector<32x64xf32>
    %68 = vector.extract_strided_slice %1 {offsets = [0, 0, 0], sizes = [1, 32, 32], strides = [1, 1, 1]} : vector<2x32x32xf32> to vector<1x32x32xf32>
    %69 = vector.shape_cast %68 : vector<1x32x32xf32> to vector<32x32xf32>
    %cst_24 = arith.constant dense<0.000000e+00> : vector<32x64xf32>
    %70 = tpu.matmul %69, %67, %cst_24 {dimension_numbers = #tpu.dot_dimension_numbers<[1], [0], [0], [1], [0, 0, 1, 1], [], []>} : vector<32x32xf32>, vector<32x64xf32>, vector<32x64xf32> -> vector<32x64xf32>
    %71 = vector.extract_strided_slice %1 {offsets = [0, 0, 0], sizes = [1, 32, 32], strides = [1, 1, 1]} : vector<2x32x32xf32> to vector<1x32x32xf32>
    %72 = vector.shape_cast %71 : vector<1x32x32xf32> to vector<32x32xf32>
    %cst_25 = arith.constant dense<0.000000e+00> : vector<32x64xf32>
    %73 = tpu.matmul %72, %70, %cst_25 {dimension_numbers = #tpu.dot_dimension_numbers<[1], [0], [0], [1], [0, 0, 1, 1], [], []>} : vector<32x32xf32>, vector<32x64xf32>, vector<32x64xf32> -> vector<32x64xf32>
    %74 = vector.extract_strided_slice %1 {offsets = [1, 0, 0], sizes = [1, 32, 32], strides = [1, 1, 1]} : vector<2x32x32xf32> to vector<1x32x32xf32>
    %75 = vector.shape_cast %74 : vector<1x32x32xf32> to vector<32x32xf32>
    %cst_26 = arith.constant dense<0.000000e+00> : vector<32x64xf32>
    %76 = tpu.matmul %75, %67, %cst_26 {dimension_numbers = #tpu.dot_dimension_numbers<[1], [0], [0], [1], [0, 0, 1, 1], [], []>} : vector<32x32xf32>, vector<32x64xf32>, vector<32x64xf32> -> vector<32x64xf32>
    %77 = vector.extract_strided_slice %1 {offsets = [1, 0, 0], sizes = [1, 32, 32], strides = [1, 1, 1]} : vector<2x32x32xf32> to vector<1x32x32xf32>
    %78 = vector.shape_cast %77 : vector<1x32x32xf32> to vector<32x32xf32>
    %cst_27 = arith.constant dense<0.000000e+00> : vector<32x64xf32>
    %79 = tpu.matmul %78, %76, %cst_27 {dimension_numbers = #tpu.dot_dimension_numbers<[1], [0], [0], [1], [0, 0, 1, 1], [], []>} : vector<32x32xf32>, vector<32x64xf32>, vector<32x64xf32> -> vector<32x64xf32>
    %80 = tpu.concatenate %67, %70, %73, %76, %79 in 1 : vector<32x64xf32>, vector<32x64xf32>, vector<32x64xf32>, vector<32x64xf32>, vector<32x64xf32> -> vector<32x320xf32>
    %81 = arith.truncf %80 : vector<32x320xf32> to vector<32x320xbf16>
    %c1 = arith.constant 1 : index
    %c0_28 = arith.constant 0 : index
    %c0_29 = arith.constant 0 : index
    %82 = vector.load %arg2[%c1, %c0_28, %c0_29] : memref<2x320x96xbf16, #tpu.memory_space<vmem>>, vector<1x320x96xbf16>
    %83 = vector.shape_cast %82 : vector<1x320x96xbf16> to vector<320x96xbf16>
    %cst_30 = arith.constant dense<0.000000e+00> : vector<32x96xf32>
    %84 = tpu.matmul %81, %83, %cst_30 {dimension_numbers = #tpu.dot_dimension_numbers<[1], [0], [0], [1], [0, 0, 1, 1], [], []>} : vector<32x320xbf16>, vector<320x96xbf16>, vector<32x96xf32> -> vector<32x96xf32>
    %c1_31 = arith.constant 1 : index
    %c0_32 = arith.constant 0 : index
    %c0_33 = arith.constant 0 : index
    %85 = vector.load %arg4[%c1_31, %c0_32, %c0_33] : memref<3x1x96xf32, #tpu.memory_space<vmem>>, vector<1x1x96xf32>
    %86 = vector.shape_cast %85 : vector<1x1x96xf32> to vector<1x96xf32>
    %87 = vector.extract_strided_slice %84 {offsets = [0, 0], sizes = [32, 64], strides = [1, 1]} : vector<32x96xf32> to vector<32x64xf32>
    %88 = vector.extract_strided_slice %86 {offsets = [0, 0], sizes = [1, 64], strides = [1, 1]} : vector<1x96xf32> to vector<1x64xf32>
    %89 = vector.broadcast %88 : vector<1x64xf32> to vector<32x64xf32>
    %90 = arith.addf %87, %89 : vector<32x64xf32>
    %91 = arith.negf %90 : vector<32x64xf32>
    %92 = math.exp %91 : vector<32x64xf32>
    %cst_34 = arith.constant 1.000000e+00 : f32
    %93 = vector.broadcast %cst_34 : f32 to vector<32x64xf32>
    %94 = arith.addf %93, %92 : vector<32x64xf32>
    %95 = arith.divf %93, %94 : vector<32x64xf32>
    %96 = vector.extract_strided_slice %95 {offsets = [0, 0], sizes = [32, 32], strides = [1, 1]} : vector<32x64xf32> to vector<32x32xf32>
    %97 = vector.extract_strided_slice %95 {offsets = [0, 32], sizes = [32, 32], strides = [1, 1]} : vector<32x64xf32> to vector<32x32xf32>
    %98 = arith.mulf %96, %66 : vector<32x32xf32>
    %99 = vector.extract_strided_slice %1 {offsets = [0, 0, 0], sizes = [1, 32, 32], strides = [1, 1, 1]} : vector<2x32x32xf32> to vector<1x32x32xf32>
    %100 = vector.shape_cast %99 : vector<1x32x32xf32> to vector<32x32xf32>
    %cst_35 = arith.constant dense<0.000000e+00> : vector<32x32xf32>
    %101 = tpu.matmul %100, %98, %cst_35 {dimension_numbers = #tpu.dot_dimension_numbers<[1], [0], [0], [1], [0, 0, 1, 1], [], []>} : vector<32x32xf32>, vector<32x32xf32>, vector<32x32xf32> -> vector<32x32xf32>
    %102 = vector.extract_strided_slice %1 {offsets = [0, 0, 0], sizes = [1, 32, 32], strides = [1, 1, 1]} : vector<2x32x32xf32> to vector<1x32x32xf32>
    %103 = vector.shape_cast %102 : vector<1x32x32xf32> to vector<32x32xf32>
    %cst_36 = arith.constant dense<0.000000e+00> : vector<32x32xf32>
    %104 = tpu.matmul %103, %101, %cst_36 {dimension_numbers = #tpu.dot_dimension_numbers<[1], [0], [0], [1], [0, 0, 1, 1], [], []>} : vector<32x32xf32>, vector<32x32xf32>, vector<32x32xf32> -> vector<32x32xf32>
    %105 = vector.extract_strided_slice %1 {offsets = [1, 0, 0], sizes = [1, 32, 32], strides = [1, 1, 1]} : vector<2x32x32xf32> to vector<1x32x32xf32>
    %106 = vector.shape_cast %105 : vector<1x32x32xf32> to vector<32x32xf32>
    %cst_37 = arith.constant dense<0.000000e+00> : vector<32x32xf32>
    %107 = tpu.matmul %106, %98, %cst_37 {dimension_numbers = #tpu.dot_dimension_numbers<[1], [0], [0], [1], [0, 0, 1, 1], [], []>} : vector<32x32xf32>, vector<32x32xf32>, vector<32x32xf32> -> vector<32x32xf32>
    %108 = vector.extract_strided_slice %1 {offsets = [1, 0, 0], sizes = [1, 32, 32], strides = [1, 1, 1]} : vector<2x32x32xf32> to vector<1x32x32xf32>
    %109 = vector.shape_cast %108 : vector<1x32x32xf32> to vector<32x32xf32>
    %cst_38 = arith.constant dense<0.000000e+00> : vector<32x32xf32>
    %110 = tpu.matmul %109, %107, %cst_38 {dimension_numbers = #tpu.dot_dimension_numbers<[1], [0], [0], [1], [0, 0, 1, 1], [], []>} : vector<32x32xf32>, vector<32x32xf32>, vector<32x32xf32> -> vector<32x32xf32>
    %111 = tpu.concatenate %98, %101, %104, %107, %110 in 1 : vector<32x32xf32>, vector<32x32xf32>, vector<32x32xf32>, vector<32x32xf32>, vector<32x32xf32> -> vector<32x160xf32>
    %112 = arith.truncf %111 : vector<32x160xf32> to vector<32x160xbf16>
    %c1_39 = arith.constant 1 : index
    %c0_40 = arith.constant 0 : index
    %c0_41 = arith.constant 0 : index
    %113 = vector.load %arg3[%c1_39, %c0_40, %c0_41] : memref<3x160x32xbf16, #tpu.memory_space<vmem>>, vector<1x160x32xbf16>
    %114 = vector.shape_cast %113 : vector<1x160x32xbf16> to vector<160x32xbf16>
    %cst_42 = arith.constant dense<0.000000e+00> : vector<32x32xf32>
    %115 = tpu.matmul %112, %114, %cst_42 {dimension_numbers = #tpu.dot_dimension_numbers<[1], [0], [0], [1], [0, 0, 1, 1], [], []>} : vector<32x160xbf16>, vector<160x32xbf16>, vector<32x32xf32> -> vector<32x32xf32>
    %116 = vector.extract_strided_slice %84 {offsets = [0, 64], sizes = [32, 32], strides = [1, 1]} : vector<32x96xf32> to vector<32x32xf32>
    %117 = arith.addf %116, %115 : vector<32x32xf32>
    %118 = vector.extract_strided_slice %86 {offsets = [0, 64], sizes = [1, 32], strides = [1, 1]} : vector<1x96xf32> to vector<1x32xf32>
    %119 = vector.broadcast %118 : vector<1x32xf32> to vector<32x32xf32>
    %120 = arith.addf %117, %119 : vector<32x32xf32>
    %121 = math.tanh %120 : vector<32x32xf32>
    %122 = arith.mulf %97, %66 : vector<32x32xf32>
    %cst_43 = arith.constant 1.000000e+00 : f32
    %123 = vector.broadcast %cst_43 : f32 to vector<32x32xf32>
    %124 = arith.subf %123, %97 : vector<32x32xf32>
    %125 = arith.mulf %124, %121 : vector<32x32xf32>
    %126 = arith.addf %122, %125 : vector<32x32xf32>
    %c2 = arith.constant 2 : index
    %c0_44 = arith.constant 0 : index
    %c0_45 = arith.constant 0 : index
    %127 = vector.load %arg3[%c2, %c0_44, %c0_45] : memref<3x160x32xbf16, #tpu.memory_space<vmem>>, vector<1x160x32xbf16>
    %128 = vector.shape_cast %127 : vector<1x160x32xbf16> to vector<160x32xbf16>
    %129 = vector.extract_strided_slice %128 {offsets = [0, 0], sizes = [32, 32], strides = [1, 1]} : vector<160x32xbf16> to vector<32x32xbf16>
    %130 = arith.truncf %126 : vector<32x32xf32> to vector<32x32xbf16>
    %cst_46 = arith.constant dense<0.000000e+00> : vector<32x32xf32>
    %131 = tpu.matmul %130, %129, %cst_46 {dimension_numbers = #tpu.dot_dimension_numbers<[1], [0], [0], [1], [0, 0, 1, 1], [], []>} : vector<32x32xbf16>, vector<32x32xbf16>, vector<32x32xf32> -> vector<32x32xf32>
    %132 = vector.extract_strided_slice %131 {offsets = [0, 0], sizes = [32, 2], strides = [1, 1]} : vector<32x32xf32> to vector<32x2xf32>
    %c2_47 = arith.constant 2 : index
    %c0_48 = arith.constant 0 : index
    %c0_49 = arith.constant 0 : index
    %133 = vector.load %arg4[%c2_47, %c0_48, %c0_49] : memref<3x1x96xf32, #tpu.memory_space<vmem>>, vector<1x1x96xf32>
    %134 = vector.shape_cast %133 : vector<1x1x96xf32> to vector<1x96xf32>
    %135 = vector.extract_strided_slice %134 {offsets = [0, 0], sizes = [1, 2], strides = [1, 1]} : vector<1x96xf32> to vector<1x2xf32>
    %136 = vector.broadcast %135 : vector<1x2xf32> to vector<32x2xf32>
    %137 = arith.addf %132, %136 : vector<32x2xf32>
    %138 = tpu.concatenate %137, %65, %126 in 1 : vector<32x2xf32>, vector<32x32xf32>, vector<32x32xf32> -> vector<32x66xf32>
    %c0_50 = arith.constant 0 : index
    %c0_51 = arith.constant 0 : index
    %139 = vector.load %arg5[%c0_50, %c0_51] : memref<32x66xf32, #tpu.memory_space<vmem>>, vector<32x66xf32>
    tpu.vector_store %arg5[%c0_50, %c0_51], %138 {strides = array<i32>} : memref<32x66xf32, #tpu.memory_space<vmem>>, vector<32x66xf32>,
    return
  }
}

</mosaic_0001>

<bundles_post_ra>
// kernel: squeeze.2
= control target key start
LH: loop header
LB: loop body
LE: loop exit
PB: predicated region body
PF: predicated region fallthrough
CT: control target
= control target key end

     0   :  { %vm39_vm0 = vcmask 1047556   ;;  %vm19_vm1 = vcmask 261120   ;;  %s78_s15 = smov 96   ;;  %s79_s16 = smov 32   ;;  %s134_s0 = inlined_call_operand.vmem [shape: f32[1,2,512], index: 0, kind: input, shape index: {}]   ;;  %s135_s1 = inlined_call_operand.vmem [shape: f32[32,32], index: 1, kind: output, shape index: {}]  }
   0x1   :  { %v66_v0 = vld [vmem:[%s134_s0 + $0x6] sm:$0x3]  ;;  %v67_v1 = vld [vmem:[%s134_s0 + $0x4] sm:$0x3]  ;;  %v68_v2 = vld [vmem:[%s134_s0 + $0x2] sm:$0x3] }
   0x2   :  { %7 = vst [vmem:[#allocation0 + $0x18] sm:$0x3] %v66_v0  ;;  %v16_v3 = vld [vmem:[%s134_s0] sm:$0x3]  ;;  %s80_s21 = smov 64  }
   0x3   :  { %11 = vst [vmem:[#allocation0 + $0x10] sm:$0x3] %v67_v1 }
   0x4   :  { %15 = vst [vmem:[#allocation0 + $0x8] sm:$0x3] %v68_v2 }
   0x5   :  { %17 = vst [vmem:[#allocation0] sm:$0x3] %v16_v3 }
   0x9   :  { %v32_v16 = vld [vmem:[#allocation0 + $0x18] sm:$0x3]  }
   0xa   :  { %v27_v4 = vld [vmem:[#allocation0 + $0x10] sm:$0x3]   ;;  %71 = vst.msk [vmem:[%s135_s1 + $0xc] ss:$16 sm:$0x3] %vm19_vm1, %v32_v16  }
   0xb   :  { %v22_v5 = vld [vmem:[#allocation0 + $0x8] sm:$0x3]   ;;  %70 = vst.msk [vmem:[%s135_s1 + $0x8] ss:$16 sm:$0x3] %vm19_vm1, %v27_v4  }
   0xc   :  { %v36_v6 = vld [vmem:[#allocation0] ss:$8 sm:$0xf]   ;;  %v38_v7 = vld [vmem:[#allocation0 - $0x1f] ss:$8 sm:$0xf0]  }
   0xd   :  { %v40_v8 = vsel %vm39_vm0, %v38_v7, %v36_v6  ;;  %v56_v9 = vld [vmem:[#allocation0] ss:$8 sm:$0xf]   ;;  %v58_v10 = vld [vmem:[#allocation0 - $0x1f] ss:$8 sm:$0xf0]  }
   0xe   :  { %41 = vrot.lane.b32.xlu0 %v40_v8, %s78_s15  ;;  %v60_v11 = vsel %vm39_vm0, %v58_v10, %v56_v9  ;;  %v46_v12 = vld [vmem:[#allocation0] ss:$8 sm:$0xf]   ;;  %69 = vst.msk [vmem:[%s135_s1 + $0x4] ss:$16 sm:$0x3] %vm19_vm1, %v22_v5  }
   0xf   :  { %61 = vrot.lane.b32.xlu1 %v60_v11, %s79_s16  ;;  %v18_v13 = vld [vmem:[#allocation0] sm:$0x3]  }
  0x10   :  { %v48_v14 = vld [vmem:[#allocation0 - $0x1f] ss:$8 sm:$0xf0]   ;;  %20 = vst.msk [vmem:[%s135_s1] ss:$16 sm:$0x3] %vm19_vm1, %v18_v13  }
  0x11   :  { %v50_v15 = vsel %vm39_vm0, %v48_v14, %v46_v12 }
  0x16   :  { %51 = vrot.lane.b32.xlu0 %v50_v15, %s80_s21 }
  0x80   :  { %v42_v17 = vpop.permute.xlu0 %41  }
  0x81   :  { %72 = vst.msk [vmem:[%s135_s1 + $0x1] ss:$4 sm:$0xff] %vm19_vm1, %v42_v17   ;;  %v62_v18 = vpop.permute.xlu1 %61  }
  0x82   :  { %74 = vst.msk [vmem:[%s135_s1 + $0x3] ss:$4 sm:$0xff] %vm19_vm1, %v62_v18  }
  0x88   :  { %v52_v19 = vpop.permute.xlu0 %51  }
  0x89   :  { %73 = vst.msk [vmem:[%s135_s1 + $0x2] ss:$4 sm:$0xff] %vm19_vm1, %v52_v19  }

// kernel: _decoder_forward_impl.1
= control target key start
LH: loop header
LB: loop body
LE: loop exit
PB: predicated region body
PF: predicated region fallthrough
CT: control target
= control target key end

     0   :  { %vm41_vm0 = vcmask 261120   ;;  %s2507_s9 = smov 34   ;;  %s2508_s10 = smov 68   ;;  %vm364_vm1 = vcmask 1044480   ;;  %vm246_vm2 = vcmask 277504   ;;  %vm251_vm3 = vcmask 556032   ;;  %s3332_s0 = inlined_call_operand.vmem [shape: f32[32,66], index: 0, kind: input, shape index: {}]   ;;  %s3333_s1 = inlined_call_operand.vmem [shape: bf16[2,32,32], index: 1, kind: input, shape index: {}]   ;;  %s3334_s2 = inlined_call_operand.vmem [shape: bf16[2,320,96], index: 2, kind: input, shape index: {}]   ;;  %s3335_s4 = inlined_call_operand.vmem [shape: f32[3,1,96], index: 4, kind: input, shape index: {}]   ;;  %s3336_s3 = inlined_call_operand.vmem [shape: bf16[3,160,32], index: 3, kind: input, shape index: {}]   ;;  %s3337_s5 = inlined_call_operand.vmem [shape: f32[32,66], index: 5, kind: output, shape index: {}]  }
   0x1   :  { %v2551_v0 = vld [vmem:[%s3332_s0 + $0x18] sm:$0xff]  ;;  %v2556_v1 = vld [vmem:[%s3332_s0 + $0x10] sm:$0xff]  ;;  %v2279_v2 = vld [vmem:[%s3333_s1] sm:$0xff]   ;;  %s2509_s21 = smov 8   ;;  %s2510_s26 = smov 126   ;;  %vm256_vm4 = vcmask 834560  }
   0x2   :  { %66 = vmatpush.msra.mxu0 %v2551_v0  ;;  %136 = vmatpush.msra.mxu2 %v2551_v0  ;;  %v2295_v3 = vld [vmem:[%s3333_s1 + $0x10] sm:$0xff]   ;;  %v2569_v4 = vld [vmem:[%s3332_s0 + $0x8] sm:$0xff]  ;;  %v2576_v5 = vld [vmem:[%s3332_s0] sm:$0xff]  ;;  %v2578_v6 = vunpack.c.l.bf16 %v2279_v2  ;;  %v2590_v8 = vunpack.c.h.bf16 %v2279_v2  ;;  %vm261_vm5 = vcmask 64512   ;;  %vm357_vm6 = vcmask 343040   ;;  %s2511_s11 = smov 32  }
   0x3   :  { %v2580_v7 = vunpack.c.l.bf16 %v2295_v3  ;;  %v2592_v9 = vunpack.c.h.bf16 %v2295_v3  ;;  %v2294_v10 = vld [vmem:[%s3333_s1 + $0x8] sm:$0xff]   ;;  %v2296_v11 = vld [vmem:[%s3333_s1 + $0x18] sm:$0xff]   ;;  %s2506_s1 = smov 102   ;;  %v2231_v33 = vld [vmem:[%s3334_s2 + $0x30] sm:$0xff]  ;;  %s2512_s12 = smov 96  }
   0x4   :  { %67 = vmatpush.msra.mxu0 %v2556_v1  ;;  %137 = vmatpush.msra.mxu2 %v2556_v1  ;;  %v2604_v12 = vunpack.c.l.bf16 %v2294_v10  ;;  %v2606_v13 = vunpack.c.l.bf16 %v2296_v11  ;;  %v2612_v14 = vunpack.c.h.bf16 %v2294_v10  ;;  %v2614_v15 = vunpack.c.h.bf16 %v2296_v11  ;;  %v2232_v31 = vld [vmem:[%s3334_s2 + $0x38] sm:$0xff]  ;;  %v2230_v36 = vld [vmem:[%s3334_s2 + $0x28] sm:$0xff]  ;;  %v2229_v37 = vld [vmem:[%s3334_s2 + $0x20] sm:$0xff]  ;;  %s2513_s27 = smov 64   ;;  %s2515_s28 = smov 94  }
   0x5   :  { %v2228_v40 = vld [vmem:[%s3334_s2 + $0x18] sm:$0xff]  ;;  %v2227_v41 = vld [vmem:[%s3334_s2 + $0x10] sm:$0xff]  ;;  %v2226_v44 = vld [vmem:[%s3334_s2 + $0x8] sm:$0xff]  ;;  %s2517_s8 = smov 2  }
   0x6   :  { %68 = vmatpush.msra.mxu0 %v2569_v4  ;;  %138 = vmatpush.msra.mxu2 %v2569_v4  ;;  %v2225_v47 = vld [vmem:[%s3334_s2] sm:$0xff]  ;;  %v2235_v48 = vld [vmem:[%s3334_s2 + $0x50] sm:$0xff]  ;;  %v2234_v50 = vld [vmem:[%s3334_s2 + $0x48] sm:$0xff] }
   0x7   :  { %v366_v49 = vsel %vm364_vm1, %v2235_v48, 0  ;;  %v2233_v51 = vld [vmem:[%s3334_s2 + $0x40] sm:$0xff] }
   0x8   :  { %69 = vmatpush.msra.mxu0 %v2576_v5  ;;  %139 = vmatpush.msra.mxu2 %v2576_v5 }
   0x9   :  { %1865 = vmatmul.msk.f32.vlgmr.msra.gmra.mxu0 %vm41_vm0, %v2578_v6  ;;  %1873 = vmatmul.msk.f32.vlgmr.msra.gmra.mxu2 %vm41_vm0, %v2580_v7 }
   0xa   :  { %2301 = vmatpush.bf16.msrb.mxu2 %v2232_v31  ;;  %368 = vmatpush.bf16.msrb.mxu0 %v2232_v31 }
   0xe   :  { %2302 = vmatpush.bf16.msrb.mxu2 %v2231_v33  ;;  %369 = vmatpush.bf16.msrb.mxu0 %v2231_v33 }
  0x11   :  { %1866 = vmatmul.msk.f32.gmra.mxu0 %vm41_vm0, %v2590_v8  ;;  %1874 = vmatmul.msk.f32.gmra.mxu2 %vm41_vm0, %v2592_v9 }
  0x12   :  { %2303 = vmatpush.bf16.msrb.mxu2 %v2230_v36  ;;  %370 = vmatpush.bf16.msrb.mxu0 %v2230_v36 }
  0x16   :  { %2304 = vmatpush.bf16.msrb.mxu2 %v2229_v37  ;;  %371 = vmatpush.bf16.msrb.mxu0 %v2229_v37 }
  0x19   :  { %1867 = vmatmul.msk.f32.gmra.mxu0 %vm41_vm0, %v2604_v12  ;;  %1875 = vmatmul.msk.f32.gmra.mxu2 %vm41_vm0, %v2606_v13 }
  0x1a   :  { %2305 = vmatpush.bf16.msrb.mxu2 %v2228_v40  ;;  %372 = vmatpush.bf16.msrb.mxu0 %v2228_v40 }
  0x1e   :  { %2306 = vmatpush.bf16.msrb.mxu2 %v2227_v41  ;;  %373 = vmatpush.bf16.msrb.mxu0 %v2227_v41 }
  0x21   :  { %1868 = vmatmul.msk.f32.gmra.mxu0 %vm41_vm0, %v2612_v14  ;;  %1876 = vmatmul.msk.f32.gmra.mxu2 %vm41_vm0, %v2614_v15 }
  0x22   :  { %2307 = vmatpush.bf16.msrb.mxu2 %v2226_v44  ;;  %374 = vmatpush.bf16.msrb.mxu0 %v2226_v44 }
  0x26   :  { %2308 = vmatpush.bf16.msrb.mxu2 %v2225_v47  ;;  %375 = vmatpush.bf16.msrb.mxu0 %v2225_v47 }
  0x86   :  { %v2620_v16 = vpop.f32.mrf.mxu0 }
  0x8c   :  { %v141_v17 = vpop.f32.mrf.mxu2 }
  0x8e   :  { %v2622_v18 = vpop.f32.mrf.mxu0 }
  0x8f   :  { %v2351_v43 = vpack.i.bf16 %v2622_v18, %v2620_v16 }
  0x94   :  { %v144_v19 = vpop.f32.mrf.mxu2 }
  0x95   :  { %v2321_v20 = vpack.i.bf16 %v144_v19, %v141_v17 }
  0x96   :  { %v77_v21 = vpop.f32.mrf.mxu0 }
  0x97   :  { %2322 = vrot.lane.b32.xlu0 %v2321_v20, %s2506_s1 }
  0x9c   :  { %v147_v22 = vpop.f32.mrf.mxu2 }
  0x9e   :  { %v80_v23 = vpop.f32.mrf.mxu0 }
  0x9f   :  { %95 = vmatpush.msra.mxu1 %v80_v23  ;;  %2297 = vmatpush.msra.mxu3 %v80_v23  ;;  %v2331_v24 = vpack.i.bf16 %v80_v23, %v77_v21 }
  0xa1   :  { %2332 = vrot.lane.b32.xlu1 %v2331_v24, %s2507_s9  ;;  %96 = vmatpush.msra.mxu1 %v77_v21 }
  0xa2   :  { %2298 = vmatpush.msra.mxu3 %v77_v21 }
  0xa3   :  { %97 = vmatpush.msra.mxu1 %v2622_v18 }
  0xa4   :  { %2299 = vmatpush.msra.mxu3 %v2622_v18  ;;  %v150_v25 = vpop.f32.mrf.mxu2 }
  0xa5   :  { %98 = vmatpush.msra.mxu1 %v2620_v16  ;;  %v2341_v26 = vpack.i.bf16 %v150_v25, %v147_v22 }
  0xa6   :  { %2300 = vmatpush.msra.mxu3 %v2620_v16  ;;  %1869 = vmatmul.msk.f32.vlgmr.msra.gmra.mxu1 %vm41_vm0, %v2578_v6 }
  0xa7   :  { %1871 = vmatmul.msk.f32.vlgmr.msra.gmra.mxu3 %vm41_vm0, %v2604_v12  ;;  %2342 = vrot.lane.b32.xlu2 %v2341_v26, %s2506_s1  ;;  %s2514_s1 = smov 30  }
  0xa8   :  { %165 = vmatpush.msrb.mxu3 %v150_v25  ;;  %392 = vmatpush.bf16.msrb.mxu1 %v366_v49 }
  0xaa   :  { %166 = vmatpush.msrb.mxu3 %v147_v22 }
  0xac   :  { %167 = vmatpush.msrb.mxu3 %v144_v19  ;;  %393 = vmatpush.bf16.msrb.mxu1 %v2234_v50 }
  0xae   :  { %168 = vmatpush.msrb.mxu3 %v141_v17  ;;  %1870 = vmatmul.msk.f32.gmra.mxu1 %vm41_vm0, %v2590_v8 }
  0xaf   :  { %1872 = vmatmul.msk.f32.gmra.mxu3 %vm41_vm0, %v2612_v14 }
  0xb0   :  { %394 = vmatpush.bf16.msrb.mxu1 %v2233_v51 }
  0xb7   :  { %1877 = vmatmul.msk.f32.vlgmr.msrb.gmra.mxu3 %vm41_vm0, %v2580_v7 }
  0xbf   :  { %1878 = vmatmul.msk.f32.gmra.mxu3 %vm41_vm0, %v2592_v9 }
  0xc7   :  { %1879 = vmatmul.msk.f32.gmra.mxu3 %vm41_vm0, %v2606_v13 }
  0xcf   :  { %1880 = vmatmul.msk.f32.gmra.mxu3 %vm41_vm0, %v2614_v15 }
 0x101   :  { %v2343_v55 = vpop.permute.xlu2 %2342 }
 0x102   :  { %v2345_v59 = vunpack.i.h.bf16 %v2343_v55  ;;  %v2344_v60 = vunpack.i.l.bf16 %v2343_v55 }
 0x109   :  { %v2323_v16 = vpop.permute.xlu0 %2322 }
 0x10a   :  { %v2325_v18 = vunpack.i.h.bf16 %v2323_v16  ;;  %v2324_v19 = vunpack.i.l.bf16 %v2323_v16 }
 0x113   :  { %v2333_v52 = vpop.permute.xlu1 %2332 }
 0x114   :  { %v2335_v53 = vunpack.i.h.bf16 %v2333_v52  ;;  %v2334_v54 = vunpack.i.l.bf16 %v2333_v52 }
 0x116   :  { %v250_v61 = vsel %vm246_vm2, %v2551_v0, %v2335_v53  ;;  %v249_v62 = vsel %vm246_vm2, %v2556_v1, %v2334_v54 }
 0x123   :  { %v100_v28 = vpop.f32.mrf.mxu1 }
 0x12a   :  { %v106_v27 = vpop.f32.mrf.mxu3 }
 0x12b   :  { %v103_v32 = vpop.f32.mrf.mxu1 }
 0x12c   :  { %v2356_v34 = vpack.i.bf16 %v103_v32, %v100_v28 }
 0x132   :  { %v109_v29 = vpop.f32.mrf.mxu3 }
 0x133   :  { %v2336_v30 = vpack.i.bf16 %v109_v29, %v106_v27 }
 0x135   :  { %2337 = vrot.lane.b32.xlu1 %v2336_v30, %s2508_s10 }
 0x13a   :  { %v170_v35 = vpop.f32.mrf.mxu3 }
 0x13d   :  { %2357 = vrot.lane.b32.xlu1 %v2356_v34, %s2508_s10 }
 0x142   :  { %v173_v38 = vpop.f32.mrf.mxu3 }
 0x143   :  { %v2326_v39 = vpack.i.bf16 %v173_v38, %v170_v35 }
 0x145   :  { %2327 = vrot.lane.b32.xlu0 %v2326_v39, %s2509_s21  ;;  %496 = vrot.lane.b32.xlu1 %v2569_v4, %s2510_s26 }
 0x14a   :  { %v176_v42 = vpop.f32.mrf.mxu3 }
 0x14d   :  { %2352 = vrot.lane.b32.xlu0 %v2351_v43, %s2507_s9 }
 0x152   :  { %v179_v45 = vpop.f32.mrf.mxu3 }
 0x153   :  { %v2346_v46 = vpack.i.bf16 %v179_v45, %v176_v42 }
 0x155   :  { %2347 = vrot.lane.b32.xlu2 %v2346_v46, %s2509_s21  ;;  %498 = vrot.lane.b32.xlu0 %v2556_v1, %s2510_s26  ;;  %v2710_v46 = vld [vmem:[%s3335_s4] ss:$0 sm:$0xff] }
 0x15d   :  { %500 = vrot.lane.b32.xlu2 %v2551_v0, %s2510_s26 }
 0x165   :  { %494 = vrot.lane.b32.xlu2 %v2576_v5, %s2510_s26 }
 0x1a7   :  { %v2338_v56 = vpop.permute.xlu1 %2337 }
 0x1a8   :  { %v2340_v57 = vunpack.i.h.bf16 %v2338_v56  ;;  %v2339_v58 = vunpack.i.l.bf16 %v2338_v56 }
 0x1aa   :  { %v255_v63 = vsel %vm251_vm3, %v250_v61, %v2340_v57  ;;  %v254_v2 = vsel %vm251_vm3, %v249_v62, %v2339_v58 }
 0x1ab   :  { %v259_v3 = vsel %vm256_vm4, %v254_v2, %v2344_v60  ;;  %v260_v10 = vsel %vm256_vm4, %v255_v63, %v2345_v59 }
 0x1ac   :  { %v268_v11 = vpack.c.bf16 %v260_v10, %v259_v3 }
 0x1ae   :  { %381 = vmatmul.bf16.vlgmr.msrb.gmra.mxu2 %v268_v11 }
 0x1af   :  { %v2358_v25 = vpop.permute.xlu1 %2357  ;;  %v2348_v31 = vpop.permute.xlu2 %2347 }
 0x1b0   :  { %v2360_v27 = vunpack.i.h.bf16 %v2358_v25  ;;  %v2359_v28 = vunpack.i.l.bf16 %v2358_v25  ;;  %v2350_v36 = vunpack.i.h.bf16 %v2348_v31  ;;  %v2349_v37 = vunpack.i.l.bf16 %v2348_v31 }
 0x1b2   :  { %v264_v41 = vsel %vm261_vm5, %v2344_v60, %v2349_v37  ;;  %v265_v42 = vsel %vm261_vm5, %v2345_v59, %v2350_v36 }
 0x1b3   :  { %v269_v43 = vpack.c.bf16 %v265_v42, %v264_v41 }
 0x1b7   :  { %v2328_v17 = vpop.permute.xlu0 %2327  ;;  %v2737_v37 = vpop.permute.xlu2 %500 }
 0x1b8   :  { %v2330_v20 = vunpack.i.h.bf16 %v2328_v17  ;;  %v2329_v21 = vunpack.i.l.bf16 %v2328_v17 }
 0x1ba   :  { %v263_v22 = vsel %vm261_vm5, %v2325_v18, %v2330_v20  ;;  %v262_v23 = vsel %vm261_vm5, %v2324_v19, %v2329_v21 }
 0x1bb   :  { %v267_v24 = vpack.c.bf16 %v263_v22, %v262_v23 }
 0x1bd   :  { %1925 = vmatmul.msk.bf16.vlgmr.msrb.gmra.mxu1 %vm357_vm6, %v267_v24 }
 0x1bf   :  { %v2353_v26 = vpop.permute.xlu0 %2352 }
 0x1c0   :  { %v2355_v29 = vunpack.i.h.bf16 %v2353_v26  ;;  %v2354_v30 = vunpack.i.l.bf16 %v2353_v26 }
 0x1c2   :  { %v248_v32 = vsel %vm246_vm2, %v2569_v4, %v2355_v29  ;;  %v247_v33 = vsel %vm246_vm2, %v2576_v5, %v2354_v30 }
 0x1c3   :  { %v253_v34 = vsel %vm251_vm3, %v248_v32, %v2360_v27  ;;  %v252_v35 = vsel %vm251_vm3, %v247_v33, %v2359_v28 }
 0x1c4   :  { %v257_v38 = vsel %vm256_vm4, %v252_v35, %v2324_v19  ;;  %v258_v39 = vsel %vm256_vm4, %v253_v34, %v2325_v18 }
 0x1c5   :  { %v266_v40 = vpack.c.bf16 %v258_v39, %v257_v38 }
 0x1c7   :  { %376 = vmatmul.bf16.vlgmr.msrb.gmra.mxu0 %v266_v40 }
 0x1cd   :  { %1926 = vmatmul.msk.bf16.gmra.mxu1 %vm357_vm6, %v269_v43 }
 0x231   :  { %v382_v50 = vpop.f32.mrf.mxu2 }
 0x239   :  { %v384_v61 = vpop.f32.mrf.mxu2 }
 0x23a   :  { %v396_v44 = vpop.f32.mrf.mxu1 }
 0x242   :  { %v398_v45 = vpop.f32.mrf.mxu1 }
 0x244   :  { %v377_v47 = vpop.f32.mrf.mxu0 }
 0x245   :  { %v2712_v48 = vadd.f32 %v396_v44, %v377_v47  ;;  %v2240_v44 = vld [vmem:[%s3336_s3 + $0x20] sm:$0xff] }
 0x247   :  { %v410_v49 = vadd.f32 %v2710_v46, %v2712_v48 }
 0x249   :  { %v1927_v51 = vmul.f32 -1.442695, %v410_v49 }
 0x24a   :  { %v401_v52 = vpop.f32.mrf.mxu1 }
 0x24b   :  { %2454 = vpow2.f32 %v1927_v51  ;;  %v2716_v53 = vadd.f32 %v401_v52, %v382_v50  ;;  %v2237_v52 = vld [vmem:[%s3336_s3 + $0x8] sm:$0xff] }
 0x24c   :  { %v379_v54 = vpop.f32.mrf.mxu0 }
 0x24d   :  { %v412_v55 = vadd.f32 %v2710_v46, %v2716_v53  ;;  %v2720_v56 = vadd.f32 %v398_v45, %v379_v54 }
 0x24f   :  { %v1929_v57 = vmul.f32 -1.442695, %v412_v55  ;;  %v411_v58 = vadd.f32 %v2710_v46, %v2720_v56 }
 0x251   :  { %v2455_v59 = vpop.eup %2454  ;;  %2456 = vpow2.f32 %v1929_v57  ;;  %v1928_v60 = vmul.f32 -1.442695, %v411_v58 }
 0x252   :  { %v403_v62 = vpop.f32.mrf.mxu1  ;;  %v2726_v2 = vadd.f32 1.0, %v2455_v59 }
 0x253   :  { %2458 = vpow2.f32 %v1928_v60  ;;  %v2724_v63 = vadd.f32 %v403_v62, %v384_v61 }
 0x254   :  { %2460 = vrcp.f32 %v2726_v2  ;;  %vm435_vm7 = vweird.f32 %v2726_v2  ;;  %v439_v55 = vand.u32 2147483647, %v2726_v2  ;;  %v441_v57 = vand.u32 2147483648, %v2726_v2 }
 0x255   :  { %v413_v3 = vadd.f32 %v2710_v46, %v2724_v63 }
 0x257   :  { %v2457_v10 = vpop.eup %2456  ;;  %v1930_v11 = vmul.f32 -1.442695, %v413_v3  ;;  %v2766_v3 = vpop.permute.xlu0 %498 }
 0x258   :  { %v428_v16 = vadd.f32 1.0, %v2457_v10 }
 0x259   :  { %v2459_v17 = vpop.eup %2458  ;;  %2462 = vpow2.f32 %v1930_v11 }
 0x25a   :  { %2464 = vrcp.f32 %v428_v16  ;;  %v427_v18 = vadd.f32 1.0, %v2459_v17  ;;  %v2731_v19 = vpop.eup %2460  ;;  %vm465_vm8 = vweird.f32 %v428_v16  ;;  %v469_v39 = vand.u32 2147483647, %v428_v16 }
 0x25b   :  { %v431_v25 = vmul.f32 %v2731_v19, %v2726_v2  ;;  %v471_v40 = vand.u32 2147483648, %v428_v16  ;;  %vm436_vm12 = vweird.f32 %v2731_v19  ;;  %v2777_v2 = vpop.permute.xlu1 %496 }
 0x25c   :  { %2466 = vrcp.f32 %v427_v18  ;;  %vm450_vm14 = vweird.f32 %v427_v18  ;;  %v454_v45 = vand.u32 2147483647, %v427_v18  ;;  %v456_v47 = vand.u32 2147483648, %v427_v18  ;;  %vm2762_vm6 = vmor %vm435_vm7, %vm436_vm12 }
 0x25d   :  { %v432_v29 = vsub.f32 1.0, %v431_v25  ;;  %v472_v58 = vor.u32 1.1754944e-38, %v471_v40  ;;  %vm470_vm5 = vcmp.eq.f32.partialorder %v469_v39, 8.507059e+37  ;;  %vm440_vm7 = vcmp.eq.f32.partialorder %v439_v55, 8.507059e+37  ;;  %v2245_v39 = vld [vmem:[%s3336_s3 + $0x48] sm:$0xff]  ;;  %v2242_v40 = vld [vmem:[%s3336_s3 + $0x30] sm:$0xff] }
 0x25e   :  { %v457_v11 = vor.u32 1.1754944e-38, %v456_v47 }
 0x25f   :  { %v2463_v20 = vpop.eup %2462  ;;  %v433_v35 = vmul.f32 %v2731_v19, %v432_v29 }
 0x260   :  { %v2465_v21 = vpop.eup %2464  ;;  %v429_v22 = vadd.f32 1.0, %v2463_v20 }
 0x261   :  { %v461_v23 = vmul.f32 %v2465_v21, %v428_v16  ;;  %vm466_vm9 = vweird.f32 %v2465_v21  ;;  %v434_v50 = vadd.f32 %v2731_v19, %v433_v35 }
 0x262   :  { %v2467_v24 = vpop.eup %2466  ;;  %2468 = vrcp.f32 %v429_v22  ;;  %v486_v38 = vand.u32 2147483648, %v429_v22  ;;  %v484_v42 = vand.u32 2147483647, %v429_v22  ;;  %vm2741_vm13 = vmor %vm465_vm8, %vm466_vm9  ;;  %vm480_vm15 = vweird.f32 %v429_v22 }
 0x263   :  { %v462_v26 = vsub.f32 1.0, %v461_v23  ;;  %v446_v27 = vmul.f32 %v2467_v24, %v427_v18  ;;  %vm451_vm10 = vweird.f32 %v2467_v24  ;;  %v438_v17 = vsel %vm2762_vm6, %v2731_v19, %v434_v50  ;;  %v2238_v50 = vld [vmem:[%s3336_s3 + $0x10] sm:$0xff] }
 0x264   :  { %vm2748_vm1 = vmor %vm450_vm14, %vm451_vm10  ;;  %v487_v54 = vor.u32 1.1754944e-38, %v486_v38  ;;  %vm485_vm4 = vcmp.eq.f32.partialorder %v484_v42, 8.507059e+37  ;;  %vm455_vm8 = vcmp.eq.f32.partialorder %v454_v45, 8.507059e+37  ;;  %v442_v18 = vor.u32 1.1754944e-38, %v441_v57  ;;  %v2243_v38 = vld [vmem:[%s3336_s3 + $0x38] sm:$0xff] }
 0x265   :  { %v447_v28 = vsub.f32 1.0, %v446_v27  ;;  %v463_v30 = vmul.f32 %v2465_v21, %v462_v26  ;;  %vm678_vm9 = vcmask 523264   ;;  %vm683_vm10 = vcmask 785408  }
 0x266   :  { %v2789_v23 = vsel %vm440_vm7, %v442_v18, %v438_v17 }
 0x267   :  { %v448_v33 = vmul.f32 %v2467_v24, %v447_v28  ;;  %v464_v36 = vadd.f32 %v2465_v21, %v463_v30 }
 0x268   :  { %v2469_v31 = vpop.eup %2468 }
 0x269   :  { %v476_v32 = vmul.f32 %v2469_v31, %v429_v22  ;;  %vm481_vm11 = vweird.f32 %v2469_v31  ;;  %v449_v43 = vadd.f32 %v2467_v24, %v448_v33  ;;  %v468_v51 = vsel %vm2741_vm13, %v2465_v21, %v464_v36  ;;  %v2787_v22 = vpop.permute.xlu2 %494 }
 0x26a   :  { %vm482_vm3 = vmor %vm480_vm15, %vm481_vm11  ;;  %v2768_v10 = vsel %vm470_vm5, %v472_v58, %v468_v51 }
 0x26b   :  { %v477_v34 = vsub.f32 1.0, %v476_v32  ;;  %v453_v60 = vsel %vm2748_vm1, %v2467_v24, %v449_v43  ;;  %v2783_v21 = vmul.f32 %v2766_v3, %v2768_v10  ;;  %v2799_v24 = vmul.f32 %v2787_v22, %v2789_v23  ;;  %v2241_v43 = vld [vmem:[%s3336_s3 + $0x28] sm:$0xff] }
 0x26c   :  { %v2779_v20 = vsel %vm455_vm8, %v457_v11, %v453_v60  ;;  %v2236_v11 = vld [vmem:[%s3336_s3] sm:$0xff] }
 0x26d   :  { %v478_v41 = vmul.f32 %v2469_v31, %v477_v34  ;;  %v2793_v19 = vmul.f32 %v2777_v2, %v2779_v20 }
 0x26f   :  { %v479_v49 = vadd.f32 %v2469_v31, %v478_v41  ;;  %v2244_v41 = vld [vmem:[%s3336_s3 + $0x40] sm:$0xff] }
 0x271   :  { %v483_v59 = vsel %vm482_vm3, %v2469_v31, %v479_v49  ;;  %v2239_v49 = vld [vmem:[%s3336_s3 + $0x18] sm:$0xff] }
 0x272   :  { %v2756_v61 = vsel %vm485_vm4, %v487_v54, %v483_v59 }
 0x273   :  { %v2772_v16 = vmul.f32 %v2737_v37, %v2756_v61 }
 0x275   :  { %522 = vmatpush.msra.mxu2 %v2772_v16  ;;  %580 = vmatpush.msra.mxu0 %v2772_v16 }
 0x277   :  { %523 = vmatpush.msra.mxu2 %v2783_v21  ;;  %581 = vmatpush.msra.mxu0 %v2783_v21 }
 0x279   :  { %524 = vmatpush.msra.mxu2 %v2793_v19  ;;  %582 = vmatpush.msra.mxu0 %v2793_v19 }
 0x27b   :  { %525 = vmatpush.msra.mxu2 %v2799_v24  ;;  %583 = vmatpush.msra.mxu0 %v2799_v24 }
 0x27c   :  { %1931 = vmatmul.msk.f32.vlgmr.msra.gmra.mxu2 %vm41_vm0, %v2578_v6  ;;  %1939 = vmatmul.msk.f32.vlgmr.msra.gmra.mxu0 %vm41_vm0, %v2580_v7 }
 0x27d   :  { %778 = vmatpush.bf16.msrb.mxu2 %v2243_v38 }
 0x281   :  { %779 = vmatpush.bf16.msrb.mxu2 %v2242_v40 }
 0x284   :  { %1932 = vmatmul.msk.f32.gmra.mxu2 %vm41_vm0, %v2590_v8  ;;  %1940 = vmatmul.msk.f32.gmra.mxu0 %vm41_vm0, %v2592_v9 }
 0x285   :  { %780 = vmatpush.bf16.msrb.mxu2 %v2241_v43 }
 0x289   :  { %781 = vmatpush.bf16.msrb.mxu2 %v2240_v44 }
 0x28c   :  { %1933 = vmatmul.msk.f32.gmra.mxu2 %vm41_vm0, %v2604_v12  ;;  %1941 = vmatmul.msk.f32.gmra.mxu0 %vm41_vm0, %v2606_v13 }
 0x28d   :  { %782 = vmatpush.bf16.msrb.mxu2 %v2239_v49 }
 0x291   :  { %783 = vmatpush.bf16.msrb.mxu2 %v2238_v50 }
 0x294   :  { %1934 = vmatmul.msk.f32.gmra.mxu2 %vm41_vm0, %v2612_v14  ;;  %1942 = vmatmul.msk.f32.gmra.mxu0 %vm41_vm0, %v2614_v15 }
 0x295   :  { %784 = vmatpush.bf16.msrb.mxu2 %v2237_v52 }
 0x299   :  { %785 = vmatpush.bf16.msrb.mxu2 %v2236_v11 }
 0x2f9   :  { %v585_v30 = vpop.f32.mrf.mxu0 }
 0x2ff   :  { %v527_v25 = vpop.f32.mrf.mxu2 }
 0x301   :  { %v588_v32 = vpop.f32.mrf.mxu0 }
 0x302   :  { %v2371_v33 = vpack.i.bf16 %v588_v32, %v585_v30 }
 0x304   :  { %2372 = vrot.lane.b32.xlu2 %v2371_v33, %s2512_s12 }
 0x307   :  { %v530_v26 = vpop.f32.mrf.mxu2 }
 0x308   :  { %v2361_v27 = vpack.i.bf16 %v530_v26, %v527_v25 }
 0x309   :  { %v591_v34 = vpop.f32.mrf.mxu0 }
 0x30a   :  { %2362 = vrot.lane.b32.xlu0 %v2361_v27, %s2511_s11 }
 0x30f   :  { %v533_v28 = vpop.f32.mrf.mxu2 }
 0x311   :  { %v594_v35 = vpop.f32.mrf.mxu0 }
 0x312   :  { %v2386_v36 = vpack.i.bf16 %v594_v35, %v591_v34  ;;  %609 = vmatpush.msra.mxu1 %v594_v35 }
 0x314   :  { %610 = vmatpush.msra.mxu1 %v591_v34  ;;  %2387 = vrot.lane.b32.xlu2 %v2386_v36, %s2512_s12 }
 0x316   :  { %611 = vmatpush.msra.mxu1 %v588_v32 }
 0x317   :  { %v536_v29 = vpop.f32.mrf.mxu2 }
 0x318   :  { %v2376_v31 = vpack.i.bf16 %v536_v29, %v533_v28  ;;  %551 = vmatpush.msra.mxu3 %v536_v29  ;;  %612 = vmatpush.msra.mxu1 %v585_v30 }
 0x319   :  { %1943 = vmatmul.msk.f32.vlgmr.msra.gmra.mxu1 %vm41_vm0, %v2580_v7 }
 0x31a   :  { %2377 = vrot.lane.b32.xlu0 %v2376_v31, %s2511_s11  ;;  %552 = vmatpush.msra.mxu3 %v533_v28 }
 0x31c   :  { %553 = vmatpush.msra.mxu3 %v530_v26 }
 0x31e   :  { %554 = vmatpush.msra.mxu3 %v527_v25 }
 0x31f   :  { %1935 = vmatmul.msk.f32.vlgmr.msra.gmra.mxu3 %vm41_vm0, %v2578_v6 }
 0x320   :  { %803 = vmatpush.bf16.msrb.mxu3 %v2245_v39 }
 0x321   :  { %1944 = vmatmul.msk.f32.gmra.mxu1 %vm41_vm0, %v2592_v9 }
 0x324   :  { %804 = vmatpush.bf16.msrb.mxu3 %v2244_v41 }
 0x327   :  { %1936 = vmatmul.msk.f32.gmra.mxu3 %vm41_vm0, %v2590_v8 }
 0x329   :  { %1945 = vmatmul.msk.f32.gmra.mxu1 %vm41_vm0, %v2606_v13 }
 0x32f   :  { %1937 = vmatmul.msk.f32.gmra.mxu3 %vm41_vm0, %v2604_v12 }
 0x331   :  { %1946 = vmatmul.msk.f32.gmra.mxu1 %vm41_vm0, %v2614_v15 }
 0x337   :  { %1938 = vmatmul.msk.f32.gmra.mxu3 %vm41_vm0, %v2612_v14 }
 0x35e   :  { %v2373_v27 = vpop.permute.xlu2 %2372 }
 0x35f   :  { %v2375_v33 = vunpack.i.h.bf16 %v2373_v27  ;;  %v2374_v34 = vunpack.i.l.bf16 %v2373_v27 }
 0x36e   :  { %v2388_v44 = vpop.permute.xlu2 %2387 }
 0x36f   :  { %v2390_v50 = vunpack.i.h.bf16 %v2388_v44 }
 0x37c   :  { %v2363_v18 = vpop.permute.xlu0 %2362 }
 0x37d   :  { %v2365_v25 = vunpack.i.h.bf16 %v2363_v18  ;;  %v2364_v26 = vunpack.i.l.bf16 %v2363_v18 }
 0x37f   :  { %v675_v31 = vsel %vm41_vm0, %v2793_v19, %v2365_v25  ;;  %v674_v32 = vsel %vm41_vm0, %v2799_v24, %v2364_v26 }
 0x38c   :  { %v2378_v41 = vpop.permute.xlu0 %2377 }
 0x38d   :  { %v2379_v43 = vunpack.i.l.bf16 %v2378_v41 }
 0x38f   :  { %v676_v49 = vsel %vm41_vm0, %v2783_v21, %v2379_v43 }
 0x396   :  { %v614_v54 = vpop.f32.mrf.mxu1 }
 0x39e   :  { %v617_v58 = vpop.f32.mrf.mxu1 }
 0x39f   :  { %v689_v59 = vpack.c.bf16 %v617_v58, %v614_v54 }
 0x3a1   :  { %1987 = vmatmul.msk.bf16.vlgmr.msrb.gmra.mxu3 %vm41_vm0, %v689_v59 }
 0x3a2   :  { %v556_v42 = vpop.f32.mrf.mxu3 }
 0x3a6   :  { %v620_v60 = vpop.f32.mrf.mxu1 }
 0x3aa   :  { %v559_v45 = vpop.f32.mrf.mxu3 }
 0x3ab   :  { %v2366_v47 = vpack.i.bf16 %v559_v45, %v556_v42  ;;  %v2380_v42 = vunpack.i.h.bf16 %v2378_v41 }
 0x3ad   :  { %2367 = vrot.lane.b32.xlu1 %v2366_v47, %s2513_s27  ;;  %v677_v24 = vsel %vm41_vm0, %v2772_v16, %v2380_v42 }
 0x3ae   :  { %v623_v62 = vpop.f32.mrf.mxu1 }
 0x3af   :  { %v691_v17 = vpack.c.bf16 %v623_v62, %v620_v60 }
 0x3b1   :  { %1988 = vmatmul.msk.bf16.gmra.mxu3 %vm41_vm0, %v691_v17 }
 0x3b2   :  { %v562_v51 = vpop.f32.mrf.mxu3 }
 0x3ba   :  { %v565_v55 = vpop.f32.mrf.mxu3 }
 0x3bb   :  { %v2381_v57 = vpack.i.bf16 %v565_v55, %v562_v51  ;;  %v2389_v51 = vunpack.i.l.bf16 %v2388_v44  ;;  %v863_v44 = vsub.f32 1.0, %v2756_v61 }
 0x3bd   :  { %2382 = vrot.lane.b32.xlu1 %v2381_v57, %s2513_s27 }
 0x41f   :  { %v2368_v28 = vpop.permute.xlu1 %2367 }
 0x420   :  { %v2370_v29 = vunpack.i.h.bf16 %v2368_v28  ;;  %v2369_v30 = vunpack.i.l.bf16 %v2368_v28 }
 0x422   :  { %v680_v35 = vsel %vm678_vm9, %v675_v31, %v2370_v29  ;;  %v679_v36 = vsel %vm678_vm9, %v674_v32, %v2369_v30 }
 0x423   :  { %v684_v38 = vsel %vm683_vm10, %v679_v36, %v2374_v34  ;;  %v685_v39 = vsel %vm683_vm10, %v680_v35, %v2375_v33 }
 0x424   :  { %v688_v40 = vpack.c.bf16 %v685_v39, %v684_v38  ;;  %v806_v59 = vpop.f32.mrf.mxu3 }
 0x426   :  { %786 = vmatmul.bf16.vlgmr.msrb.gmra.mxu2 %v688_v40 }
 0x42c   :  { %v808_v62 = vpop.f32.mrf.mxu3 }
 0x42f   :  { %v2383_v19 = vpop.permute.xlu1 %2382 }
 0x430   :  { %v2385_v45 = vunpack.i.h.bf16 %v2383_v19  ;;  %v2384_v47 = vunpack.i.l.bf16 %v2383_v19 }
 0x432   :  { %v681_v52 = vsel %vm678_vm9, %v676_v49, %v2384_v47  ;;  %v682_v54 = vsel %vm678_vm9, %v677_v24, %v2385_v45 }
 0x433   :  { %v686_v55 = vsel %vm683_vm10, %v681_v52, %v2389_v51  ;;  %v687_v57 = vsel %vm683_vm10, %v682_v54, %v2390_v50  ;;  %v861_v51 = vsub.f32 1.0, %v2779_v20 }
 0x434   :  { %v690_v58 = vpack.c.bf16 %v687_v57, %v686_v55  ;;  %v811_v21 = vpop.f32.mrf.mxu3  ;;  %v860_v57 = vsub.f32 1.0, %v2789_v23 }
 0x436   :  { %791 = vmatmul.bf16.gmra.mxu2 %v690_v58 }
 0x43c   :  { %v813_v25 = vpop.f32.mrf.mxu3 }
 0x4a9   :  { %v787_v60 = vpop.f32.mrf.mxu2 }
 0x4aa   :  { %v807_v28 = vadd.f32 %v806_v59, %v787_v60 }
 0x4b1   :  { %v789_v11 = vpop.f32.mrf.mxu2 }
 0x4b2   :  { %v809_v16 = vadd.f32 %v808_v62, %v789_v11 }
 0x4b4   :  { %822 = vrot.lane.b32.xlu2 %v809_v16, %s2513_s27 }
 0x4b9   :  { %v792_v17 = vpop.f32.mrf.mxu2 }
 0x4ba   :  { %v812_v18 = vadd.f32 %v811_v21, %v792_v17 }
 0x4bc   :  { %824 = vrot.lane.b32.xlu1 %v812_v18, %s2513_s27  ;;  %846 = vrot.lane.b32.xlu2 %v2569_v4, %s2514_s1 }
 0x4c1   :  { %v794_v26 = vpop.f32.mrf.mxu2 }
 0x4c2   :  { %v814_v27 = vadd.f32 %v813_v25, %v794_v26 }
 0x4c4   :  { %826 = vrot.lane.b32.xlu0 %v814_v27, %s2513_s27  ;;  %850 = vrot.lane.b32.xlu1 %v2551_v0, %s2514_s1 }
 0x4cc   :  { %820 = vrot.lane.b32.xlu0 %v807_v28, %s2513_s27 }
 0x4d4   :  { %848 = vrot.lane.b32.xlu0 %v2556_v1, %s2514_s1 }
 0x50e   :  { %v823_v29 = vpop.permute.xlu2 %822 }
 0x50f   :  { %v833_v30 = vadd.f32 %v823_v29, %v2720_v56 }
 0x511   :  { %v837_v31 = vadd.f32 %v2710_v46, %v833_v30 }
 0x513   :  { %2470 = vtanh.f32 %v837_v31 }
 0x519   :  { %v2471_v32 = vpop.eup %2470 }
 0x51a   :  { %870 = vrot.lane.b32.xlu0 %v2471_v32, %s2512_s12 }
 0x52e   :  { %v825_v4 = vpop.permute.xlu1 %824 }
 0x52f   :  { %v834_v33 = vadd.f32 %v825_v4, %v2716_v53 }
 0x531   :  { %v838_v34 = vadd.f32 %v2710_v46, %v834_v33 }
 0x533   :  { %2472 = vtanh.f32 %v838_v34 }
 0x536   :  { %v827_v0 = vpop.permute.xlu0 %826  ;;  %v851_v41 = vpop.permute.xlu1 %850 }
 0x537   :  { %v835_v35 = vadd.f32 %v827_v0, %v2724_v63  ;;  %v847_v63 = vpop.permute.xlu2 %846 }
 0x539   :  { %v2473_v36 = vpop.eup %2472  ;;  %v839_v1 = vadd.f32 %v2710_v46, %v835_v35 }
 0x53a   :  { %872 = vrot.lane.b32.xlu1 %v2473_v36, %s2512_s12 }
 0x53b   :  { %2474 = vtanh.f32 %v839_v1 }
 0x53e   :  { %v821_v56 = vpop.permute.xlu0 %820 }
 0x53f   :  { %v832_v38 = vadd.f32 %v821_v56, %v2712_v48  ;;  %v862_v48 = vsub.f32 1.0, %v2768_v10  ;;  %v2253_v56 = vld [vmem:[%s3334_s2 + $0xd8] sm:$0xff] }
 0x541   :  { %v2475_v39 = vpop.eup %2474  ;;  %v836_v40 = vadd.f32 %v2710_v46, %v832_v38  ;;  %v859_v46 = vmul.f32 %v851_v41, %v2756_v61  ;;  %v2248_v41 = vld [vmem:[%s3334_s2 + $0xb0] sm:$0xff] }
 0x542   :  { %844 = vrot.lane.b32.xlu1 %v2576_v5, %s2514_s1  ;;  %874 = vrot.lane.b32.xlu2 %v2475_v39, %s2512_s12  ;;  %v2252_v39 = vld [vmem:[%s3334_s2 + $0xd0] sm:$0xff] }
 0x543   :  { %2476 = vtanh.f32 %v836_v40  ;;  %v2251_v40 = vld [vmem:[%s3334_s2 + $0xc8] sm:$0xff] }
 0x546   :  { %v849_v42 = vpop.permute.xlu0 %848 }
 0x547   :  { %v858_v5 = vmul.f32 %v849_v42, %v2768_v10  ;;  %v857_v10 = vmul.f32 %v847_v63, %v2779_v20  ;;  %v2249_v63 = vld [vmem:[%s3334_s2 + $0xb8] sm:$0xff]  ;;  %v2247_v42 = vld [vmem:[%s3334_s2 + $0xa8] sm:$0xff] }
 0x549   :  { %v2477_v53 = vpop.eup %2476 }
 0x54a   :  { %868 = vrot.lane.b32.xlu2 %v2477_v53, %s2512_s12  ;;  %v2250_v53 = vld [vmem:[%s3334_s2 + $0xc0] sm:$0xff] }
 0x58c   :  { %v871_v50 = vpop.permute.xlu0 %870 }
 0x58d   :  { %v881_v55 = vmul.f32 %v871_v50, %v861_v51 }
 0x58f   :  { %v2926_v60 = vadd.f32 %v881_v55, %v857_v10  ;;  %v2260_v55 = vld [vmem:[%s3334_s2 + $0x110] sm:$0xff]  ;;  %v2257_v10 = vld [vmem:[%s3334_s2 + $0xf8] sm:$0xff] }
 0x59c   :  { %v875_v43 = vpop.permute.xlu2 %874 }
 0x59d   :  { %v883_v19 = vmul.f32 %v875_v43, %v863_v44  ;;  %v2502_v43 = vld [vmem:[%s3332_s0 + $0x18] sm:$0xff]  ;;  %v2503_v44 = vld [vmem:[%s3332_s0 + $0x10] sm:$0xff] }
 0x59f   :  { %v2915_v24 = vadd.f32 %v883_v19, %v859_v46  ;;  %v2504_v19 = vld [vmem:[%s3332_s0 + $0x8] sm:$0xff]  ;;  %v2261_v46 = vld [vmem:[%s3334_s2 + $0x118] sm:$0xff] }
 0x5a4   :  { %v869_v54 = vpop.permute.xlu2 %868 }
 0x5a5   :  { %v880_v58 = vmul.f32 %v869_v54, %v860_v57  ;;  %v2259_v57 = vld [vmem:[%s3334_s2 + $0x108] sm:$0xff] }
 0x5ac   :  { %v873_v45 = vpop.permute.xlu1 %872 }
 0x5ad   :  { %v882_v47 = vmul.f32 %v873_v45, %v862_v48  ;;  %v2246_v48 = vld [vmem:[%s3334_s2 + $0xa0] sm:$0xff] }
 0x5ae   :  { %v2505_v45 = vld [vmem:[%s3332_s0] sm:$0xff] }
 0x5af   :  { %v2917_v49 = vadd.f32 %v882_v47, %v858_v5 }
 0x5b1   :  { %v2391_v52 = vpack.i.bf16 %v2917_v49, %v2915_v24 }
 0x5b3   :  { %2392 = vrot.lane.b32.xlu0 %v2391_v52, %s2512_s12 }
 0x5b4   :  { %v845_v61 = vpop.permute.xlu1 %844 }
 0x5b5   :  { %v856_v59 = vmul.f32 %v845_v61, %v2789_v23  ;;  %v2258_v61 = vld [vmem:[%s3334_s2 + $0x100] sm:$0xff] }
 0x5b7   :  { %v2928_v62 = vadd.f32 %v880_v58, %v856_v59  ;;  %v2256_v58 = vld [vmem:[%s3334_s2 + $0xf0] sm:$0xff]  ;;  %v2255_v59 = vld [vmem:[%s3334_s2 + $0xe8] sm:$0xff] }
 0x5b9   :  { %v2396_v11 = vpack.i.bf16 %v2928_v62, %v2926_v60 }
 0x5bb   :  { %2397 = vrot.lane.b32.xlu1 %v2396_v11, %s2512_s12  ;;  %v2265_v11 = vld [vmem:[%s3334_s2 + $0x138] sm:$0xff] }
 0x625   :  { %v2393_v16 = vpop.permute.xlu0 %2392 }
 0x626   :  { %v2395_v21 = vunpack.i.h.bf16 %v2393_v16  ;;  %v2394_v17 = vunpack.i.l.bf16 %v2393_v16  ;;  %v2254_v16 = vld [vmem:[%s3334_s2 + $0xe0] sm:$0xff] }
 0x628   :  { %v2935_v18 = vsel %vm41_vm0, %v2394_v17, %v2737_v37  ;;  %v2941_v20 = vsel %vm41_vm0, %v2395_v21, %v2766_v3  ;;  %v2264_v21 = vld [vmem:[%s3334_s2 + $0x130] sm:$0xff]  ;;  %v2263_v17 = vld [vmem:[%s3334_s2 + $0x128] sm:$0xff] }
 0x629   :  { %920 = vmatpush.msrb.mxu0 %v2935_v18  ;;  %978 = vmatpush.msra.mxu2 %v2935_v18 }
 0x62b   :  { %921 = vmatpush.msrb.mxu0 %v2941_v20  ;;  %979 = vmatpush.msra.mxu2 %v2941_v20 }
 0x62d   :  { %v2398_v23 = vpop.permute.xlu1 %2397 }
 0x62e   :  { %v2400_v25 = vunpack.i.h.bf16 %v2398_v23  ;;  %v2399_v26 = vunpack.i.l.bf16 %v2398_v23 }
 0x630   :  { %v2947_v27 = vsel %vm41_vm0, %v2399_v26, %v2777_v2  ;;  %v2953_v28 = vsel %vm41_vm0, %v2400_v25, %v2787_v22 }
 0x631   :  { %922 = vmatpush.msrb.mxu0 %v2947_v27  ;;  %980 = vmatpush.msra.mxu2 %v2947_v27 }
 0x633   :  { %923 = vmatpush.msrb.mxu0 %v2953_v28  ;;  %981 = vmatpush.msra.mxu2 %v2953_v28 }
 0x634   :  { %1989 = vmatmul.msk.f32.vlgmr.msrb.gmra.mxu0 %vm41_vm0, %v2578_v6  ;;  %1997 = vmatmul.msk.f32.vlgmr.msra.gmra.mxu2 %vm41_vm0, %v2580_v7 }
 0x635   :  { %1237 = vmatpush.bf16.msra.mxu0 %v2253_v56  ;;  %1279 = vmatpush.bf16.msrb.mxu2 %v2265_v11 }
 0x639   :  { %1238 = vmatpush.bf16.msra.mxu0 %v2252_v39  ;;  %1280 = vmatpush.bf16.msrb.mxu2 %v2264_v21 }
 0x63c   :  { %1990 = vmatmul.msk.f32.gmra.mxu0 %vm41_vm0, %v2590_v8  ;;  %1998 = vmatmul.msk.f32.gmra.mxu2 %vm41_vm0, %v2592_v9 }
 0x63d   :  { %1239 = vmatpush.bf16.msra.mxu0 %v2251_v40  ;;  %1281 = vmatpush.bf16.msrb.mxu2 %v2263_v17 }
 0x641   :  { %1240 = vmatpush.bf16.msra.mxu0 %v2250_v53 }
 0x644   :  { %1991 = vmatmul.msk.f32.gmra.mxu0 %vm41_vm0, %v2604_v12  ;;  %1999 = vmatmul.msk.f32.gmra.mxu2 %vm41_vm0, %v2606_v13 }
 0x645   :  { %1241 = vmatpush.bf16.msra.mxu0 %v2249_v63 }
 0x649   :  { %1242 = vmatpush.bf16.msra.mxu0 %v2248_v41 }
 0x64c   :  { %1992 = vmatmul.msk.f32.gmra.mxu0 %vm41_vm0, %v2612_v14  ;;  %2000 = vmatmul.msk.f32.gmra.mxu2 %vm41_vm0, %v2614_v15 }
 0x64d   :  { %1243 = vmatpush.bf16.msra.mxu0 %v2247_v42 }
 0x651   :  { %1244 = vmatpush.bf16.msra.mxu0 %v2246_v48 }
 0x6b1   :  { %v925_v29 = vpop.f32.mrf.mxu0 }
 0x6b7   :  { %v983_v30 = vpop.f32.mrf.mxu2 }
 0x6b9   :  { %v928_v31 = vpop.f32.mrf.mxu0 }
 0x6ba   :  { %v2401_v32 = vpack.i.bf16 %v928_v31, %v925_v29 }
 0x6bc   :  { %2402 = vrot.lane.b32.xlu2 %v2401_v32, %s2513_s27 }
 0x6bf   :  { %v986_v4 = vpop.f32.mrf.mxu2 }
 0x6c0   :  { %v2406_v33 = vpack.i.bf16 %v986_v4, %v983_v30 }
 0x6c1   :  { %v931_v34 = vpop.f32.mrf.mxu0 }
 0x6c2   :  { %2407 = vrot.lane.b32.xlu0 %v2406_v33, %s2513_s27 }
 0x6c7   :  { %v989_v0 = vpop.f32.mrf.mxu2 }
 0x6c9   :  { %v934_v35 = vpop.f32.mrf.mxu0 }
 0x6ca   :  { %v2411_v36 = vpack.i.bf16 %v934_v35, %v931_v34  ;;  %949 = vmatpush.msrb.mxu1 %v934_v35  ;;  %1385 = vrot.lane.b32.xlu0 %v2502_v43, %s2515_s28 }
 0x6cc   :  { %2412 = vrot.lane.b32.xlu1 %v2411_v36, %s2513_s27  ;;  %950 = vmatpush.msrb.mxu1 %v931_v34 }
 0x6ce   :  { %951 = vmatpush.msrb.mxu1 %v928_v31 }
 0x6cf   :  { %v992_v1 = vpop.f32.mrf.mxu2 }
 0x6d0   :  { %v2416_v38 = vpack.i.bf16 %v992_v1, %v989_v0  ;;  %952 = vmatpush.msrb.mxu1 %v925_v29  ;;  %1007 = vmatpush.msra.mxu3 %v992_v1  ;;  %v2262_v29 = vld [vmem:[%s3334_s2 + $0x120] sm:$0xff] }
 0x6d1   :  { %1993 = vmatmul.msk.f32.vlgmr.msrb.gmra.mxu1 %vm41_vm0, %v2578_v6  ;;  %1282 = vmatpush.bf16.msrb.mxu2 %v2262_v29 }
 0x6d2   :  { %1008 = vmatpush.msra.mxu3 %v989_v0  ;;  %2417 = vrot.lane.b32.xlu2 %v2416_v38, %s2513_s27 }
 0x6d3   :  { %1379 = vrot.lane.b32.xlu0 %v2505_v45, %s2515_s28  ;;  %1256 = vmatpush.bf16.msra.mxu1 %v2261_v46 }
 0x6d4   :  { %1009 = vmatpush.msra.mxu3 %v986_v4  ;;  %1383 = vrot.lane.b32.xlu1 %v2503_v44, %s2515_s28 }
 0x6d6   :  { %1010 = vmatpush.msra.mxu3 %v983_v30 }
 0x6d7   :  { %2001 = vmatmul.msk.f32.vlgmr.msra.gmra.mxu3 %vm41_vm0, %v2580_v7  ;;  %1257 = vmatpush.bf16.msra.mxu1 %v2260_v55 }
 0x6d9   :  { %1994 = vmatmul.msk.f32.gmra.mxu1 %vm41_vm0, %v2590_v8 }
 0x6da   :  { %1381 = vrot.lane.b32.xlu2 %v2504_v19, %s2515_s28 }
 0x6db   :  { %1258 = vmatpush.bf16.msra.mxu1 %v2259_v57 }
 0x6df   :  { %2002 = vmatmul.msk.f32.gmra.mxu3 %vm41_vm0, %v2592_v9  ;;  %1259 = vmatpush.bf16.msra.mxu1 %v2258_v61 }
 0x6e1   :  { %1995 = vmatmul.msk.f32.gmra.mxu1 %vm41_vm0, %v2604_v12 }
 0x6e3   :  { %1260 = vmatpush.bf16.msra.mxu1 %v2257_v10 }
 0x6e7   :  { %2003 = vmatmul.msk.f32.gmra.mxu3 %vm41_vm0, %v2606_v13  ;;  %1261 = vmatpush.bf16.msra.mxu1 %v2256_v58 }
 0x6e9   :  { %1996 = vmatmul.msk.f32.gmra.mxu1 %vm41_vm0, %v2612_v14 }
 0x6eb   :  { %1262 = vmatpush.bf16.msra.mxu1 %v2255_v59 }
 0x6ef   :  { %2004 = vmatmul.msk.f32.gmra.mxu3 %vm41_vm0, %v2614_v15  ;;  %1263 = vmatpush.bf16.msra.mxu1 %v2254_v16 }
 0x716   :  { %v2403_v5 = vpop.permute.xlu2 %2402 }
 0x717   :  { %v2405_v47 = vunpack.i.h.bf16 %v2403_v5  ;;  %v2404_v50 = vunpack.i.l.bf16 %v2403_v5 }
 0x719   :  { %v1057_v51 = vsel %vm678_vm9, %v2947_v27, %v2405_v47  ;;  %v1056_v52 = vsel %vm678_vm9, %v2953_v28, %v2404_v50 }
 0x71a   :  { %v1064_v54 = vpack.c.bf16 %v1057_v51, %v1056_v52  ;;  %v3084_v52 = vld [vmem:[%s3335_s4 + $0x1] ss:$0 sm:$0xff] }
 0x71c   :  { %1245 = vmatmul.bf16.vlgmr.msra.gmra.mxu0 %v1064_v54 }
 0x72c   :  { %v2418_v1 = vpop.permute.xlu2 %2417 }
 0x72d   :  { %v2420_v39 = vunpack.i.h.bf16 %v2418_v1  ;;  %v2419_v40 = vunpack.i.l.bf16 %v2418_v1 }
 0x734   :  { %v2408_v32 = vpop.permute.xlu0 %2407 }
 0x735   :  { %v2410_v4 = vunpack.i.h.bf16 %v2408_v32  ;;  %v2409_v33 = vunpack.i.l.bf16 %v2408_v32 }
 0x73e   :  { %v2413_v23 = vpop.permute.xlu1 %2412 }
 0x73f   :  { %v2415_v25 = vunpack.i.h.bf16 %v2413_v23  ;;  %v2414_v26 = vunpack.i.l.bf16 %v2413_v23 }
 0x741   :  { %v1058_v27 = vsel %vm678_vm9, %v2941_v20, %v2414_v26  ;;  %v1059_v28 = vsel %vm678_vm9, %v2935_v18, %v2415_v25 }
 0x742   :  { %v1067_v30 = vpack.c.bf16 %v1059_v28, %v1058_v27 }
 0x744   :  { %1250 = vmatmul.bf16.gmra.mxu0 %v1067_v30 }
 0x74e   :  { %v954_v31 = vpop.f32.mrf.mxu1 }
 0x74f   :  { %v1060_v0 = vsel %vm678_vm9, %v954_v31, %v2409_v33 }
 0x756   :  { %v957_v34 = vpop.f32.mrf.mxu1 }
 0x757   :  { %v1061_v35 = vsel %vm678_vm9, %v957_v34, %v2410_v4 }
 0x758   :  { %v1065_v20 = vpack.c.bf16 %v1061_v35, %v1060_v0 }
 0x75a   :  { %v1012_v36 = vpop.f32.mrf.mxu3  ;;  %1264 = vmatmul.bf16.vlgmr.msra.gmra.mxu1 %v1065_v20 }
 0x75e   :  { %v960_v18 = vpop.f32.mrf.mxu1 }
 0x75f   :  { %v1062_v63 = vsel %vm678_vm9, %v960_v18, %v2419_v40 }
 0x762   :  { %v1015_v56 = vpop.f32.mrf.mxu3 }
 0x763   :  { %v1066_v38 = vpack.c.bf16 %v1015_v56, %v1012_v36 }
 0x765   :  { %2125 = vmatmul.msk.bf16.vlgmr.msrb.gmra.mxu2 %vm678_vm9, %v1066_v38 }
 0x766   :  { %v963_v53 = vpop.f32.mrf.mxu1 }
 0x767   :  { %v1063_v41 = vsel %vm678_vm9, %v963_v53, %v2420_v39 }
 0x768   :  { %v1068_v42 = vpack.c.bf16 %v1063_v41, %v1062_v63 }
 0x76a   :  { %v1018_v43 = vpop.f32.mrf.mxu3  ;;  %1269 = vmatmul.bf16.gmra.mxu1 %v1068_v42 }
 0x772   :  { %v1021_v44 = vpop.f32.mrf.mxu3 }
 0x773   :  { %v1069_v19 = vpack.c.bf16 %v1021_v44, %v1018_v43 }
 0x775   :  { %2126 = vmatmul.msk.bf16.gmra.mxu2 %vm678_vm9, %v1069_v19 }
 0x799   :  { %v1246_v45 = vpop.f32.mrf.mxu0 }
 0x7a1   :  { %v1248_v50 = vpop.f32.mrf.mxu0 }
 0x7c1   :  { %v1251_v59 = vpop.f32.mrf.mxu0 }
 0x7c9   :  { %v1253_v29 = vpop.f32.mrf.mxu0 }
 0x7d7   :  { %v1265_v48 = vpop.f32.mrf.mxu1 }
 0x7d8   :  { %v1266_v47 = vadd.f32 %v1265_v48, %v1246_v45 }
 0x7df   :  { %v1267_v46 = vpop.f32.mrf.mxu1 }
 0x7e0   :  { %v1268_v54 = vadd.f32 %v1267_v46, %v1248_v50  ;;  %v1386_v50 = vpop.permute.xlu0 %1385 }
 0x7e7   :  { %v1270_v10 = vpop.f32.mrf.mxu1 }
 0x7e8   :  { %v1284_v5 = vpop.f32.mrf.mxu2  ;;  %v1271_v21 = vadd.f32 %v1270_v10, %v1251_v59 }
 0x7e9   :  { %v3079_v51 = vadd.f32 %v1284_v5, %v1266_v47 }
 0x7eb   :  { %v1299_v55 = vadd.f32 %v3084_v52, %v3079_v51 }
 0x7ed   :  { %v2128_v11 = vmul.f32 -1.442695, %v1299_v55 }
 0x7ef   :  { %2478 = vpow2.f32 %v2128_v11  ;;  %v1272_v26 = vpop.f32.mrf.mxu1 }
 0x7f0   :  { %v1286_v57 = vpop.f32.mrf.mxu2  ;;  %v1273_v31 = vadd.f32 %v1272_v26, %v1253_v29 }
 0x7f1   :  { %v3088_v61 = vadd.f32 %v1286_v57, %v1268_v54 }
 0x7f3   :  { %v1300_v58 = vadd.f32 %v3084_v52, %v3088_v61 }
 0x7f5   :  { %v2129_v16 = vmul.f32 -1.442695, %v1300_v58  ;;  %v2479_v28 = vpop.eup %2478 }
 0x7f6   :  { %v3096_v4 = vadd.f32 1.0, %v2479_v28 }
 0x7f7   :  { %2480 = vpow2.f32 %v2129_v16 }
 0x7f8   :  { %v1289_v17 = vpop.f32.mrf.mxu2  ;;  %vm1324_vm11 = vweird.f32 %v3096_v4  ;;  %v1328_v28 = vand.u32 2147483647, %v3096_v4  ;;  %v1330_v29 = vand.u32 2147483648, %v3096_v4 }
 0x7f9   :  { %v3092_v23 = vadd.f32 %v1289_v17, %v1271_v21 }
 0x7fb   :  { %v1301_v25 = vadd.f32 %v3084_v52, %v3092_v23 }
 0x7fd   :  { %v2130_v27 = vmul.f32 -1.442695, %v1301_v25  ;;  %v2481_v30 = vpop.eup %2480  ;;  %v2274_v25 = vld [vmem:[%s3336_s3 + $0x90] sm:$0xff] }
 0x7fe   :  { %v3100_v34 = vadd.f32 1.0, %v2481_v30 }
 0x7ff   :  { %2482 = vpow2.f32 %v2130_v27 }
 0x800   :  { %v1291_v32 = vpop.f32.mrf.mxu2  ;;  %2484 = vrcp.f32 %v3096_v4  ;;  %vm1339_vm3 = vweird.f32 %v3100_v34  ;;  %v1343_v11 = vand.u32 2147483647, %v3100_v34  ;;  %v1345_v16 = vand.u32 2147483648, %v3100_v34 }
 0x801   :  { %v3098_v33 = vadd.f32 %v1291_v32, %v1273_v31  ;;  %2486 = vrcp.f32 %v3100_v34 }
 0x803   :  { %v1302_v0 = vadd.f32 %v3084_v52, %v3098_v33 }
 0x805   :  { %v2483_v35 = vpop.eup %2482  ;;  %v2131_v20 = vmul.f32 -1.442695, %v1302_v0 }
 0x806   :  { %v1317_v36 = vadd.f32 1.0, %v2483_v35  ;;  %v3106_v18 = vpop.eup %2484  ;;  %v1346_v35 = vor.u32 1.1754944e-38, %v1345_v16 }
 0x807   :  { %2488 = vpow2.f32 %v2131_v20  ;;  %v2487_v1 = vpop.eup %2486  ;;  %v1320_v63 = vmul.f32 %v3106_v18, %v3096_v4  ;;  %vm1325_vm1 = vweird.f32 %v3106_v18  ;;  %v1384_v20 = vpop.permute.xlu1 %1383 }
 0x808   :  { %2490 = vrcp.f32 %v1317_v36  ;;  %v1335_v40 = vmul.f32 %v2487_v1, %v3100_v34  ;;  %vm1340_vm12 = vweird.f32 %v2487_v1  ;;  %vm1354_vm14 = vweird.f32 %v1317_v36  ;;  %v1382_v4 = vpop.permute.xlu2 %1381 }
 0x809   :  { %v1321_v43 = vsub.f32 1.0, %v1320_v63  ;;  %v1358_v54 = vand.u32 2147483647, %v1317_v36  ;;  %v1360_v55 = vand.u32 2147483648, %v1317_v36  ;;  %vm3123_vm5 = vmor %vm1339_vm3, %vm1340_vm12  ;;  %v1380_v63 = vpop.permute.xlu0 %1379 }
 0x80a   :  { %v1336_v42 = vsub.f32 1.0, %v1335_v40 }
 0x80b   :  { %v1322_v46 = vmul.f32 %v3106_v18, %v1321_v43  ;;  %v1361_v30 = vor.u32 1.1754944e-38, %v1360_v55  ;;  %vm1359_vm7 = vcmp.eq.f32.partialorder %v1358_v54, 8.507059e+37 }
 0x80c   :  { %v1337_v45 = vmul.f32 %v2487_v1, %v1336_v42 }
 0x80d   :  { %v2489_v56 = vpop.eup %2488  ;;  %v1323_v17 = vadd.f32 %v3106_v18, %v1322_v46 }
 0x80e   :  { %v2491_v38 = vpop.eup %2490  ;;  %v1318_v39 = vadd.f32 1.0, %v2489_v56  ;;  %v1338_v10 = vadd.f32 %v2487_v1, %v1337_v45 }
 0x80f   :  { %v1350_v53 = vmul.f32 %v2491_v38, %v1317_v36  ;;  %vm1355_vm13 = vweird.f32 %v2491_v38 }
 0x810   :  { %2492 = vrcp.f32 %v1318_v39  ;;  %v1375_v57 = vand.u32 2147483648, %v1318_v39  ;;  %v1373_v59 = vand.u32 2147483647, %v1318_v39  ;;  %vm3117_vm4 = vmor %vm1354_vm14, %vm1355_vm13  ;;  %vm1369_vm6 = vweird.f32 %v1318_v39 }
 0x811   :  { %v1351_v41 = vsub.f32 1.0, %v1350_v53  ;;  %v1342_v32 = vsel %vm3123_vm5, %v2487_v1, %v1338_v10  ;;  %vm3138_vm13 = vmor %vm1324_vm11, %vm1325_vm1  ;;  %vm1344_vm14 = vcmp.eq.f32.partialorder %v1343_v11, 8.507059e+37  ;;  %vm1329_vm11 = vcmp.eq.f32.partialorder %v1328_v28, 8.507059e+37  ;;  %v2268_v10 = vld [vmem:[%s3336_s3 + $0x60] sm:$0xff]  ;;  %v2266_v28 = vld [vmem:[%s3336_s3 + $0x50] sm:$0xff] }
 0x812   :  { %v1376_v31 = vor.u32 1.1754944e-38, %v1375_v57  ;;  %vm1374_vm12 = vcmp.eq.f32.partialorder %v1373_v59, 8.507059e+37  ;;  %v1327_v1 = vsel %vm3138_vm13, %v3106_v18, %v1323_v17  ;;  %v3152_v40 = vsel %vm1344_vm14, %v1346_v35, %v1342_v32  ;;  %v2267_v59 = vld [vmem:[%s3336_s3 + $0x58] sm:$0xff] }
 0x813   :  { %v1352_v44 = vmul.f32 %v2491_v38, %v1351_v41  ;;  %v3162_v18 = vmul.f32 %v1382_v4, %v3152_v40  ;;  %v2275_v17 = vld [vmem:[%s3336_s3 + $0x98] sm:$0xff] }
 0x815   :  { %v1353_v47 = vadd.f32 %v2491_v38, %v1352_v44 }
 0x816   :  { %v2493_v19 = vpop.eup %2492 }
 0x817   :  { %v1365_v48 = vmul.f32 %v2493_v19, %v1318_v39  ;;  %vm1370_vm15 = vweird.f32 %v2493_v19  ;;  %v1357_v26 = vsel %vm3117_vm4, %v2491_v38, %v1353_v47  ;;  %v1331_v39 = vor.u32 1.1754944e-38, %v1330_v29 }
 0x818   :  { %vm1371_vm8 = vmor %vm1369_vm6, %vm1370_vm15  ;;  %v3142_v36 = vsel %vm1359_vm7, %v1361_v30, %v1357_v26 }
 0x819   :  { %v1366_v5 = vsub.f32 1.0, %v1365_v48  ;;  %v3155_v53 = vmul.f32 %v1384_v20, %v3142_v36  ;;  %v3159_v41 = vsel %vm1329_vm11, %v1331_v39, %v1327_v1 }
 0x81a   :  { %v3167_v42 = vmul.f32 %v1380_v63, %v3159_v41 }
 0x81b   :  { %v1367_v58 = vmul.f32 %v2493_v19, %v1366_v5 }
 0x81d   :  { %v1368_v27 = vadd.f32 %v2493_v19, %v1367_v58 }
 0x81f   :  { %v1372_v34 = vsel %vm1371_vm8, %v2493_v19, %v1368_v27 }
 0x820   :  { %v3144_v56 = vsel %vm1374_vm12, %v1376_v31, %v1372_v34 }
 0x821   :  { %v3150_v38 = vmul.f32 %v1386_v50, %v3144_v56 }
 0x823   :  { %1407 = vmatpush.msrb.mxu3 %v3150_v38  ;;  %1465 = vmatpush.msrb.mxu1 %v3150_v38 }
 0x825   :  { %1408 = vmatpush.msrb.mxu3 %v3155_v53  ;;  %1466 = vmatpush.msrb.mxu1 %v3155_v53 }
 0x827   :  { %1409 = vmatpush.msrb.mxu3 %v3162_v18  ;;  %1467 = vmatpush.msrb.mxu1 %v3162_v18 }
 0x829   :  { %1410 = vmatpush.msrb.mxu3 %v3167_v42  ;;  %1468 = vmatpush.msrb.mxu1 %v3167_v42 }
 0x82a   :  { %2132 = vmatmul.msk.f32.vlgmr.msrb.gmra.mxu3 %vm41_vm0, %v2578_v6  ;;  %2140 = vmatmul.msk.f32.vlgmr.msrb.gmra.mxu1 %vm41_vm0, %v2580_v7 }
 0x832   :  { %2133 = vmatmul.msk.f32.gmra.mxu3 %vm41_vm0, %v2590_v8  ;;  %2141 = vmatmul.msk.f32.gmra.mxu1 %vm41_vm0, %v2592_v9 }
 0x83a   :  { %2134 = vmatmul.msk.f32.gmra.mxu3 %vm41_vm0, %v2604_v12  ;;  %2142 = vmatmul.msk.f32.gmra.mxu1 %vm41_vm0, %v2606_v13 }
 0x842   :  { %2135 = vmatmul.msk.f32.gmra.mxu3 %vm41_vm0, %v2612_v14  ;;  %2143 = vmatmul.msk.f32.gmra.mxu1 %vm41_vm0, %v2614_v15 }
 0x8a7   :  { %v1470_v46 = vpop.f32.mrf.mxu1 }
 0x8ad   :  { %v1412_v43 = vpop.f32.mrf.mxu3 }
 0x8af   :  { %v1473_v47 = vpop.f32.mrf.mxu1 }
 0x8b0   :  { %v2431_v50 = vpack.i.bf16 %v1473_v47, %v1470_v46 }
 0x8b2   :  { %2432 = vrot.lane.b32.xlu0 %v2431_v50, %s2512_s12 }
 0x8b5   :  { %v1415_v44 = vpop.f32.mrf.mxu3 }
 0x8b6   :  { %v2421_v19 = vpack.i.bf16 %v1415_v44, %v1412_v43 }
 0x8b7   :  { %v1476_v54 = vpop.f32.mrf.mxu1 }
 0x8b8   :  { %2422 = vrot.lane.b32.xlu1 %v2421_v19, %s2511_s11 }
 0x8bd   :  { %v1418_v48 = vpop.f32.mrf.mxu3 }
 0x8bf   :  { %v1479_v55 = vpop.f32.mrf.mxu1 }
 0x8c0   :  { %v2446_v57 = vpack.i.bf16 %v1479_v55, %v1476_v54  ;;  %1494 = vmatpush.msra.mxu2 %v1479_v55 }
 0x8c2   :  { %1495 = vmatpush.msra.mxu2 %v1476_v54  ;;  %2447 = vrot.lane.b32.xlu0 %v2446_v57, %s2512_s12 }
 0x8c4   :  { %1496 = vmatpush.msra.mxu2 %v1473_v47 }
 0x8c5   :  { %v1421_v45 = vpop.f32.mrf.mxu3 }
 0x8c6   :  { %v2436_v5 = vpack.i.bf16 %v1421_v45, %v1418_v48  ;;  %1436 = vmatpush.msrb.mxu0 %v1421_v45  ;;  %1497 = vmatpush.msra.mxu2 %v1470_v46 }
 0x8c7   :  { %2144 = vmatmul.msk.f32.vlgmr.msra.gmra.mxu2 %vm41_vm0, %v2580_v7  ;;  %v2271_v7 = vld [vmem:[%s3336_s3 + $0x78] sm:$0xff] }
 0x8c8   :  { %2437 = vrot.lane.b32.xlu1 %v2436_v5, %s2511_s11  ;;  %1437 = vmatpush.msrb.mxu0 %v1418_v48 }
 0x8ca   :  { %1438 = vmatpush.msrb.mxu0 %v1415_v44 }
 0x8cc   :  { %1439 = vmatpush.msrb.mxu0 %v1412_v43 }
 0x8cd   :  { %2136 = vmatmul.msk.f32.vlgmr.msrb.gmra.mxu0 %vm41_vm0, %v2578_v6  ;;  %v2273_v6 = vld [vmem:[%s3336_s3 + $0x88] sm:$0xff] }
 0x8ce   :  { %1662 = vmatpush.bf16.msra.mxu3 %v2273_v6  ;;  %1687 = vmatpush.bf16.msra.mxu0 %v2275_v17 }
 0x8cf   :  { %2145 = vmatmul.msk.f32.gmra.mxu2 %vm41_vm0, %v2592_v9  ;;  %v2270_v9 = vld [vmem:[%s3336_s3 + $0x70] sm:$0xff] }
 0x8d2   :  { %1688 = vmatpush.bf16.msra.mxu0 %v2274_v25 }
 0x8d5   :  { %2137 = vmatmul.msk.f32.gmra.mxu0 %vm41_vm0, %v2590_v8  ;;  %v2272_v8 = vld [vmem:[%s3336_s3 + $0x80] sm:$0xff] }
 0x8d6   :  { %1663 = vmatpush.bf16.msra.mxu3 %v2272_v8 }
 0x8d7   :  { %2146 = vmatmul.msk.f32.gmra.mxu2 %vm41_vm0, %v2606_v13 }
 0x8da   :  { %1664 = vmatpush.bf16.msra.mxu3 %v2271_v7 }
 0x8dd   :  { %2138 = vmatmul.msk.f32.gmra.mxu0 %vm41_vm0, %v2604_v12 }
 0x8de   :  { %1665 = vmatpush.bf16.msra.mxu3 %v2270_v9 }
 0x8df   :  { %2147 = vmatmul.msk.f32.gmra.mxu2 %vm41_vm0, %v2614_v15  ;;  %v2269_v15 = vld [vmem:[%s3336_s3 + $0x68] sm:$0xff] }
 0x8e2   :  { %1666 = vmatpush.bf16.msra.mxu3 %v2269_v15 }
 0x8e5   :  { %2139 = vmatmul.msk.f32.gmra.mxu0 %vm41_vm0, %v2612_v14 }
 0x8e6   :  { %1667 = vmatpush.bf16.msra.mxu3 %v2268_v10 }
 0x8ea   :  { %1668 = vmatpush.bf16.msra.mxu3 %v2267_v59 }
 0x8ee   :  { %1669 = vmatpush.bf16.msra.mxu3 %v2266_v28 }
 0x924   :  { %v2433_v35 = vpop.permute.xlu0 %2432 }
 0x925   :  { %v2435_v43 = vunpack.i.h.bf16 %v2433_v35  ;;  %v2434_v44 = vunpack.i.l.bf16 %v2433_v35 }
 0x92a   :  { %v2423_v32 = vpop.permute.xlu1 %2422 }
 0x92b   :  { %v2425_v34 = vunpack.i.h.bf16 %v2423_v32  ;;  %v2424_v0 = vunpack.i.l.bf16 %v2423_v32 }
 0x92d   :  { %v1560_v4 = vsel %vm41_vm0, %v3162_v18, %v2425_v34  ;;  %v1559_v63 = vsel %vm41_vm0, %v3167_v42, %v2424_v0 }
 0x934   :  { %v2448_v55 = vpop.permute.xlu0 %2447 }
 0x935   :  { %v2449_v7 = vunpack.i.l.bf16 %v2448_v55 }
 0x93a   :  { %v2438_v47 = vpop.permute.xlu1 %2437 }
 0x93b   :  { %v2440_v50 = vunpack.i.h.bf16 %v2438_v47  ;;  %v2439_v54 = vunpack.i.l.bf16 %v2438_v47 }
 0x93d   :  { %v1562_v42 = vsel %vm41_vm0, %v3150_v38, %v2440_v50  ;;  %v1561_v8 = vsel %vm41_vm0, %v3155_v53, %v2439_v54  ;;  %v1735_v54 = vsub.f32 1.0, %v3144_v56 }
 0x94a   :  { %v1441_v12 = vpop.f32.mrf.mxu0  ;;  %v1499_v21 = vpop.f32.mrf.mxu2 }
 0x952   :  { %v1444_v13 = vpop.f32.mrf.mxu0  ;;  %v1502_v26 = vpop.f32.mrf.mxu2 }
 0x953   :  { %v2426_v14 = vpack.i.bf16 %v1444_v13, %v1441_v12  ;;  %v1572_v27 = vpack.c.bf16 %v1502_v26, %v1499_v21  ;;  %v2450_v12 = vunpack.i.h.bf16 %v2448_v55 }
 0x955   :  { %2427 = vrot.lane.b32.xlu2 %v2426_v14, %s2513_s27  ;;  %2208 = vmatmul.msk.bf16.vlgmr.msra.gmra.mxu0 %vm41_vm0, %v1572_v27 }
 0x95a   :  { %v1447_v58 = vpop.f32.mrf.mxu0  ;;  %v1505_v29 = vpop.f32.mrf.mxu2 }
 0x962   :  { %v1450_v11 = vpop.f32.mrf.mxu0  ;;  %v1508_v30 = vpop.f32.mrf.mxu2 }
 0x963   :  { %v2441_v16 = vpack.i.bf16 %v1450_v11, %v1447_v58  ;;  %v1574_v31 = vpack.c.bf16 %v1508_v30, %v1505_v29 }
 0x965   :  { %2442 = vrot.lane.b32.xlu2 %v2441_v16, %s2513_s27  ;;  %2209 = vmatmul.msk.bf16.gmra.mxu0 %vm41_vm0, %v1574_v31 }
 0x9af   :  { %v2428_v20 = vpop.permute.xlu2 %2427 }
 0x9b0   :  { %v2430_v1 = vunpack.i.h.bf16 %v2428_v20  ;;  %v2429_v39 = vunpack.i.l.bf16 %v2428_v20 }
 0x9b2   :  { %v1564_v19 = vsel %vm678_vm9, %v1560_v4, %v2430_v1  ;;  %v1563_v48 = vsel %vm678_vm9, %v1559_v63, %v2429_v39 }
 0x9b3   :  { %v1567_v45 = vsel %vm683_vm10, %v1563_v48, %v2434_v44  ;;  %v1568_v46 = vsel %vm683_vm10, %v1564_v19, %v2435_v43  ;;  %v1732_v19 = vsub.f32 1.0, %v3159_v41  ;;  %v1733_v48 = vsub.f32 1.0, %v3152_v40 }
 0x9b4   :  { %v1571_v5 = vpack.c.bf16 %v1568_v46, %v1567_v45  ;;  %v1728_v45 = vmul.f32 %v3159_v41, %v2787_v22  ;;  %v1729_v46 = vmul.f32 %v3152_v40, %v2777_v2  ;;  %v2277_v22 = vld [vmem:[%s3336_s3 + $0xa8] sm:$0xff]  ;;  %v2276_v2 = vld [vmem:[%s3336_s3 + $0xa0] sm:$0xff]  ;;  %v1731_v40 = vmul.f32 %v3144_v56, %v2737_v37 }
 0x9b5   :  { %1797 = vmatpush.bf16.msra.mxu1 %v2277_v22 }
 0x9b6   :  { %1670 = vmatmul.bf16.vlgmr.msra.gmra.mxu3 %v1571_v5 }
 0x9b9   :  { %1798 = vmatpush.bf16.msra.mxu1 %v2276_v2 }
 0x9bf   :  { %v2443_v18 = vpop.permute.xlu2 %2442 }
 0x9c0   :  { %v2445_v57 = vunpack.i.h.bf16 %v2443_v18  ;;  %v2444_v6 = vunpack.i.l.bf16 %v2443_v18 }
 0x9c2   :  { %v1566_v9 = vsel %vm678_vm9, %v1562_v42, %v2445_v57  ;;  %v1565_v13 = vsel %vm678_vm9, %v1561_v8, %v2444_v6  ;;  %v1730_v57 = vmul.f32 %v3142_v36, %v2766_v3  ;;  %v2453_v3 = vld [vmem:[%s3335_s4 + $0x2] ss:$0 sm:$0xff]  ;;  %vm1847_vm9 = vcmask 15360  }
 0x9c3   :  { %v1569_v14 = vsel %vm683_vm10, %v1565_v13, %v2449_v7  ;;  %v1570_v15 = vsel %vm683_vm10, %v1566_v9, %v2450_v12  ;;  %vm1856_vm10 = vcmask 539648  }
 0x9c4   :  { %v1573_v10 = vpack.c.bf16 %v1570_v15, %v1569_v14 }
 0x9c6   :  { %1675 = vmatmul.bf16.gmra.mxu3 %v1573_v10 }
 0x9d2   :  { %v1690_v58 = vpop.f32.mrf.mxu0 }
 0x9da   :  { %v1692_v38 = vpop.f32.mrf.mxu0 }
 0x9e2   :  { %v1695_v21 = vpop.f32.mrf.mxu0 }
 0x9ea   :  { %v1697_v27 = vpop.f32.mrf.mxu0 }
 0xa39   :  { %v1671_v59 = vpop.f32.mrf.mxu3 }
 0xa3a   :  { %v1691_v11 = vadd.f32 %v1690_v58, %v1671_v59 }
 0xa3c   :  { %1704 = vrot.lane.b32.xlu1 %v1691_v11, %s2513_s27 }
 0xa41   :  { %v1673_v16 = vpop.f32.mrf.mxu3 }
 0xa42   :  { %v1693_v53 = vadd.f32 %v1692_v38, %v1673_v16 }
 0xa44   :  { %1706 = vrot.lane.b32.xlu2 %v1693_v53, %s2513_s27 }
 0xa49   :  { %v1676_v17 = vpop.f32.mrf.mxu3 }
 0xa4a   :  { %v1696_v25 = vadd.f32 %v1695_v21, %v1676_v17 }
 0xa4c   :  { %1708 = vrot.lane.b32.xlu0 %v1696_v25, %s2513_s27 }
 0xa51   :  { %v1678_v26 = vpop.f32.mrf.mxu3 }
 0xa52   :  { %v1698_v28 = vadd.f32 %v1697_v27, %v1678_v26 }
 0xa54   :  { %1710 = vrot.lane.b32.xlu1 %v1698_v28, %s2513_s27  ;;  %s2516_s27 = smov 98  }
 0xa9e   :  { %v1707_v29 = vpop.permute.xlu2 %1706 }
 0xa9f   :  { %v1717_v30 = vadd.f32 %v1707_v29, %v3088_v61 }
 0xaa1   :  { %v1721_v31 = vadd.f32 %v3084_v52, %v1717_v30 }
 0xaa3   :  { %2494 = vtanh.f32 %v1721_v31 }
 0xaa9   :  { %v2495_v32 = vpop.eup %2494 }
 0xaaa   :  { %1742 = vrot.lane.b32.xlu0 %v2495_v32, %s2512_s12 }
 0xaae   :  { %v1705_v34 = vpop.permute.xlu1 %1704 }
 0xaaf   :  { %v1716_v0 = vadd.f32 %v1705_v34, %v3079_v51 }
 0xab1   :  { %v1720_v35 = vadd.f32 %v3084_v52, %v1716_v0 }
 0xab3   :  { %2496 = vtanh.f32 %v1720_v35 }
 0xab9   :  { %v2497_v20 = vpop.eup %2496 }
 0xaba   :  { %1740 = vrot.lane.b32.xlu2 %v2497_v20, %s2512_s12 }
 0xabe   :  { %v1709_v1 = vpop.permute.xlu0 %1708 }
 0xabf   :  { %v1718_v39 = vadd.f32 %v1709_v1, %v3092_v23 }
 0xac1   :  { %v1722_v61 = vadd.f32 %v3084_v52, %v1718_v39 }
 0xac3   :  { %2498 = vtanh.f32 %v1722_v61 }
 0xac6   :  { %v1711_v4 = vpop.permute.xlu1 %1710 }
 0xac7   :  { %v1719_v63 = vadd.f32 %v1711_v4, %v3098_v33 }
 0xac9   :  { %v2499_v43 = vpop.eup %2498  ;;  %v1723_v44 = vadd.f32 %v3084_v52, %v1719_v63 }
 0xaca   :  { %1744 = vrot.lane.b32.xlu1 %v2499_v43, %s2512_s12 }
 0xacb   :  { %2500 = vtanh.f32 %v1723_v44 }
 0xad1   :  { %v2501_v51 = vpop.eup %2500 }
 0xad2   :  { %1746 = vrot.lane.b32.xlu2 %v2501_v51, %s2512_s12 }
 0xada   :  { %1819 = vrot.lane.b32.xlu2 %v2928_v62, %s2516_s27 }
 0xae2   :  { %1825 = vrot.lane.b32.xlu2 %v2915_v24, %s2516_s27 }
 0xb14   :  { %v1741_v23 = vpop.permute.xlu2 %1740 }
 0xb15   :  { %v1752_v33 = vmul.f32 %v1741_v23, %v1732_v19 }
 0xb17   :  { %v1756_v47 = vadd.f32 %v1752_v33, %v1728_v45 }
 0xb1c   :  { %v1743_v52 = vpop.permute.xlu0 %1742 }
 0xb1d   :  { %v1753_v5 = vmul.f32 %v1743_v52, %v1733_v48 }
 0xb1f   :  { %v1757_v50 = vadd.f32 %v1753_v5, %v1729_v46 }
 0xb21   :  { %v1765_v62 = vpack.c.bf16 %v1757_v50, %v1756_v47 }
 0xb23   :  { %1769 = vrot.lane.b32.xlu0 %v1765_v62, %s2512_s12 }
 0xb2b   :  { %1821 = vrot.lane.b32.xlu0 %v2926_v60, %s2516_s27  ;;  %v1734_v60 = vsub.f32 1.0, %v3142_v36 }
 0xb2c   :  { %v1747_v24 = vpop.permute.xlu2 %1746 }
 0xb2d   :  { %v1755_v41 = vmul.f32 %v1747_v24, %v1735_v54 }
 0xb2f   :  { %v1759_v55 = vadd.f32 %v1755_v41, %v1731_v40 }
 0xb33   :  { %1835 = vrot.lane.b32.xlu0 %v1756_v47, %s2517_s8 }
 0xb34   :  { %v1820_v13 = vpop.permute.xlu2 %1819 }
 0xb3b   :  { %1841 = vrot.lane.b32.xlu0 %v1759_v55, %s2517_s8 }
 0xb3c   :  { %v1745_v18 = vpop.permute.xlu1 %1744  ;;  %v1826_v16 = vpop.permute.xlu2 %1825 }
 0xb3d   :  { %v1754_v6 = vmul.f32 %v1745_v18, %v1734_v60 }
 0xb3f   :  { %v1758_v42 = vadd.f32 %v1754_v6, %v1730_v57 }
 0xb41   :  { %1839 = vrot.lane.b32.xlu2 %v1758_v42, %s2517_s8  ;;  %v1766_v8 = vpack.c.bf16 %v1759_v55, %v1758_v42 }
 0xb43   :  { %1771 = vrot.lane.b32.xlu1 %v1766_v8, %s2512_s12 }
 0xb4b   :  { %1823 = vrot.lane.b32.xlu1 %v2917_v49, %s2516_s27 }
 0xb53   :  { %1837 = vrot.lane.b32.xlu1 %v1757_v50, %s2517_s8 }
 0xb95   :  { %v1770_v37 = vpop.permute.xlu0 %1769 }
 0xb96   :  { %2222 = vmatmul.msk.bf16.vlgmr.msra.gmra.mxu1 %vm41_vm0, %v1770_v37 }
 0xb9b   :  { %v1840_v17 = vpop.permute.xlu2 %1839 }
 0xb9d   :  { %v1822_v12 = vpop.permute.xlu0 %1821 }
 0xba5   :  { %v1836_v14 = vpop.permute.xlu0 %1835 }
 0xbad   :  { %v1842_v29 = vpop.permute.xlu0 %1841 }
 0xbb5   :  { %v1772_v56 = vpop.permute.xlu1 %1771 }
 0xbb6   :  { %2223 = vmatmul.msk.bf16.gmra.mxu1 %vm41_vm0, %v1772_v56 }
 0xbbd   :  { %v1824_v7 = vpop.permute.xlu1 %1823 }
 0xbc5   :  { %v1838_v59 = vpop.permute.xlu1 %1837 }
 0xc13   :  { %v1800_v36 = vpop.f32.mrf.mxu1 }
 0xc14   :  { %v1815_v9 = vadd.f32 %v2453_v3, %v1800_v36 }
 0xc16   :  { %v1848_v49 = vsel %vm1847_vm9, %v1815_v9, %v1820_v13 }
 0xc17   :  { %v1852_v15 = vsel %vm246_vm2, %v1848_v49, %v1836_v14 }
 0xc18   :  { %1857 = vst.msk [vmem:[%s3337_s5] sm:$0xff] %vm1856_vm10, %v1852_v15 }
 0xc1b   :  { %v1802_v10 = vpop.f32.mrf.mxu1 }
 0xc1c   :  { %v1816_v58 = vadd.f32 %v2453_v3, %v1802_v10 }
 0xc1e   :  { %v1849_v11 = vsel %vm1847_vm9, %v1816_v58, %v1822_v12 }
 0xc1f   :  { %v1853_v38 = vsel %vm246_vm2, %v1849_v11, %v1838_v59 }
 0xc20   :  { %1858 = vst.msk [vmem:[%s3337_s5 + $0x8] sm:$0xff] %vm1856_vm10, %v1853_v38 }
 0xc33   :  { %v1805_v53 = vpop.f32.mrf.mxu1 }
 0xc34   :  { %v1817_v21 = vadd.f32 %v2453_v3, %v1805_v53 }
 0xc36   :  { %v1850_v25 = vsel %vm1847_vm9, %v1817_v21, %v1824_v7 }
 0xc37   :  { %v1854_v26 = vsel %vm246_vm2, %v1850_v25, %v1840_v17 }
 0xc38   :  { %1859 = vst.msk [vmem:[%s3337_s5 + $0x10] sm:$0xff] %vm1856_vm10, %v1854_v26 }
 0xc3b   :  { %v1807_v27 = vpop.f32.mrf.mxu1 }
 0xc3c   :  { %v1818_v28 = vadd.f32 %v2453_v3, %v1807_v27 }
 0xc3e   :  { %v1851_v30 = vsel %vm1847_vm9, %v1818_v28, %v1826_v16 }
 0xc3f   :  { %v1855_v31 = vsel %vm246_vm2, %v1851_v30, %v1842_v29 }
 0xc40   :  { %1860 = vst.msk [vmem:[%s3337_s5 + $0x18] sm:$0xff] %vm1856_vm10, %v1855_v31 }

</bundles_post_ra>
